<compile_context>
chip_gen: v5e
topology: v5e:2x2
jax: 0.10.0
libtpu: 0.0.40
codegen_flags: <defaults>
</compile_context>

<pallas_src>
import math
import numpy as np

import jax
import jax.numpy as jnp
from jax.experimental import pallas as pl
from jax.experimental.pallas import tpu as pltpu

IN_DIM = 57     # emb_dim
HID = 64        # per-direction LSTM hidden size
FC_DIM = 5
OUT_DIM = 2
B_TILE = 128    # desired batch rows per grid program


def _sigmoid(x):
    # sigmoid(x) == 0.5 * tanh(0.5 * x) + 0.5 : single EUP op per element.
    return 0.5 * jnp.tanh(0.5 * x) + 0.5


def robust_lstm_kernel(x_ref,        # (T, B_tile, D)   time-major input tile
                       wih_ref,      # (D, 8H)   fused-gate input projection
                       bih_ref,      # (1, 8H)   combined b_ih + b_hh, fused layout
                       whh_ref,      # (2H, 8H)  block-diagonal recurrent weight
                       wfc_ref,      # (2H, FC)
                       bfc_ref,      # (1, FC)
                       wout_ref,     # (FC, OUT)
                       bout_ref,     # (1, OUT)
                       out_ref):     # (B_tile, OUT)
    T, B, D = x_ref.shape
    H = HID
    G = 8 * H                                   # 512 fused gate columns

    # ---- hoisted input projection: one (T*B, D) @ (D, 8H) MXU matmul
    # covering both directions and all timesteps, biases folded in once.
    # Stored time-major so g[t] below is a free leading-dim slice. ----
    x2d = x_ref[...].reshape(T * B, D)
    gproj = (jnp.dot(x2d, wih_ref[...], preferred_element_type=jnp.float32)
             + bih_ref[...]).reshape(T, B, G)

    whh = whh_ref[...]

    # Lane mask: True on the forward-direction half (first 64 lanes) of each
    # 128-lane fused gate slab.  Forward gates read gproj[t], backward gates
    # read gproj[T-1-t]; one full-slab select per step combines them.
    lane = jax.lax.broadcasted_iota(jnp.int32, (B, G), 1)
    fwd_mask = (lane % (2 * H)) < H

    h = jnp.zeros((B, 2 * H), jnp.float32)      # [h_fwd | h_bwd]
    c = jnp.zeros((B, 2 * H), jnp.float32)      # [c_fwd | c_bwd]

    # ---- fused bidirectional recurrence, fully unrolled (T static & small):
    # ONE (B,128)@(128,512) recurrent matmul per step, all gate math full-vreg.
    # TODO(synk): for T beyond ~16 switch to lax.fori_loop(..., unroll=small).
    for t in range(T):
        pre = jnp.where(fwd_mask, gproj[t], gproj[T - 1 - t])
        gates = pre + jnp.dot(h, whh, preferred_element_type=jnp.float32)
        i_g = _sigmoid(gates[:, 0 * H:2 * H])   # [i_f | i_b]
        f_g = _sigmoid(gates[:, 2 * H:4 * H])   # [f_f | f_b]
        g_g = jnp.tanh(gates[:, 4 * H:6 * H])   # [g_f | g_b]
        o_g = _sigmoid(gates[:, 6 * H:8 * H])   # [o_f | o_b]
        c = f_g * c + i_g * g_g
        h = o_g * jnp.tanh(c)

    # ---- head: fused h already equals concat([h_f, h_b]); single matmuls. ----
    fc_pre = (jnp.dot(h, wfc_ref[...], preferred_element_type=jnp.float32)
              + bfc_ref[...])
    o2 = jnp.maximum(fc_pre, 0.0)                                    # ReLU
    out_ref[...] = (jnp.dot(o2, wout_ref[...], preferred_element_type=jnp.float32)
                    + bout_ref[...])


def _pick_b_tile(batch, desired=B_TILE):
    """Large batch tile (MXU fill), but >=2 grid programs when batch allows."""
    b8 = pl.cdiv(batch, 8) * 8
    tile = min(desired, b8)
    if b8 >= 16:
        half = pl.cdiv(pl.cdiv(b8, 2), 8) * 8   # ~half the batch, sublane-aligned
        tile = min(tile, half)
    return max(tile, 8)


def _fuse_gate_weights(params):
    """Build fused-gate weights: every gate is a 128-lane slab [fwd(64)|bwd(64)]."""
    H, D = HID, IN_DIM
    # input projection, column layout [i_f|i_b | f_f|f_b | g_f|g_b | o_f|o_b]
    wih = jnp.stack([params["w_ih_f"].T.reshape(D, 4, H),
                     params["w_ih_b"].T.reshape(D, 4, H)],
                    axis=2).reshape(D, 8 * H)
    b_f = (params["b_ih_f"] + params["b_hh_f"]).reshape(4, H)
    b_b = (params["b_ih_b"] + params["b_hh_b"]).reshape(4, H)
    bih = jnp.stack([b_f, b_b], axis=1).reshape(1, 8 * H)
    # block-diagonal recurrent weight: rows 0:H act on h_fwd, rows H:2H on h_bwd
    zeros = jnp.zeros((H, 4, H), jnp.float32)
    top = jnp.stack([params["w_hh_f"].T.reshape(H, 4, H), zeros],
                    axis=2).reshape(H, 8 * H)
    bot = jnp.stack([zeros, params["w_hh_b"].T.reshape(H, 4, H)],
                    axis=2).reshape(H, 8 * H)
    whh = jnp.concatenate([top, bot], axis=0)   # (2H, 8H)
    return wih, bih, whh


def robust_lstm_forward(x, params, *, b_tile=None):
    """x: (B, T, D) batch-first float32 — same layout as the PyTorch module."""
    B, T, D = x.shape
    x = x.astype(jnp.float32)

    if b_tile is None:
        b_tile = _pick_b_tile(B)
    b_pad = pl.cdiv(B, b_tile) * b_tile
    if b_pad != B:
        x = jnp.pad(x, ((0, b_pad - B), (0, 0), (0, 0)))
    # time-major layout so per-step gate reads in the kernel are free views
    xt = jnp.transpose(x, (1, 0, 2))            # (T, b_pad, D)

    wih, bih, whh = _fuse_gate_weights(params)
    args = (
        xt, wih, bih, whh,
        params["w_fc"].T, params["b_fc"][None, :],
        params["w_out"].T, params["b_out"][None, :],
    )

    def weight_spec(shape):
        return pl.BlockSpec(shape, lambda i: (0,) * len(shape))

    in_specs = [pl.BlockSpec((T, b_tile, D), lambda i: (0, i, 0))]
    in_specs += [weight_spec(a.shape) for a in args[1:]]

    out = pl.pallas_call(
        robust_lstm_kernel,
        out_shape=jax.ShapeDtypeStruct((b_pad, OUT_DIM), jnp.float32),
        grid=(b_pad // b_tile,),
        in_specs=in_specs,
        out_specs=pl.BlockSpec((b_tile, OUT_DIM), lambda i: (i, 0)),
        compiler_params=pltpu.CompilerParams(
            dimension_semantics=("parallel",)),
    )(*args)
    return out[:B]


def init_params(key):
    """Deterministic synthetic parameters matching nn.LSTM / nn.Linear shapes."""
    k = 1.0 / math.sqrt(HID)
    lstm_shapes = [
        ("w_ih_f", (4 * HID, IN_DIM)), ("w_hh_f", (4 * HID, HID)),
        ("b_ih_f", (4 * HID,)), ("b_hh_f", (4 * HID,)),
        ("w_ih_b", (4 * HID, IN_DIM)), ("w_hh_b", (4 * HID, HID)),
        ("b_ih_b", (4 * HID,)), ("b_hh_b", (4 * HID,)),
    ]
    keys = jax.random.split(key, len(lstm_shapes) + 4)
    params = {}
    for (name, shape), kk in zip(lstm_shapes, keys):
        params[name] = jax.random.uniform(kk, shape, jnp.float32, -k, k)

    kfc = 1.0 / math.sqrt(2 * HID)
    params["w_fc"] = jax.random.uniform(keys[-4], (FC_DIM, 2 * HID), jnp.float32, -kfc, kfc)
    params["b_fc"] = jax.random.uniform(keys[-3], (FC_DIM,), jnp.float32, -kfc, kfc)
    ko = 1.0 / math.sqrt(FC_DIM)
    params["w_out"] = jax.random.uniform(keys[-2], (OUT_DIM, FC_DIM), jnp.float32, -ko, ko)
    params["b_out"] = jax.random.uniform(keys[-1], (OUT_DIM,), jnp.float32, -ko, ko)
    return params


def reference_forward(x, params):
    """Pure-JAX reference of the same bidirectional-LSTM head."""
    def run_dir(xs, w_ih, w_hh, b):
        def step(carry, x_t):
            h, c = carry
            gates = x_t @ w_ih.T + h @ w_hh.T + b
            i_g = jax.nn.sigmoid(gates[:, 0 * HID:1 * HID])
            f_g = jax.nn.sigmoid(gates[:, 1 * HID:2 * HID])
            g_g = jnp.tanh(gates[:, 2 * HID:3 * HID])
            o_g = jax.nn.sigmoid(gates[:, 3 * HID:4 * HID])
            c_new = f_g * c + i_g * g_g
            h_new = o_g * jnp.tanh(c_new)
            return (h_new, c_new), None
        B = xs.shape[1]
        init = (jnp.zeros((B, HID), jnp.float32), jnp.zeros((B, HID), jnp.float32))
        (h, _), _ = jax.lax.scan(step, init, xs)
        return h

    x_tm = jnp.transpose(x, (1, 0, 2))
    h_f = run_dir(x_tm, params["w_ih_f"], params["w_hh_f"],
                  params["b_ih_f"] + params["b_hh_f"])
    h_b = run_dir(x_tm[::-1], params["w_ih_b"], params["w_hh_b"],
                  params["b_ih_b"] + params["b_hh_b"])
    hidden = jnp.concatenate([h_f, h_b], axis=1)
    o2 = jnp.maximum(hidden @ params["w_fc"].T + params["b_fc"], 0.0)
    return o2 @ params["w_out"].T + params["b_out"]


if __name__ == "__main__":
    key = jax.random.PRNGKey(0)
    pkey, xkey1, xkey2, xkey3 = jax.random.split(key, 4)
    params = init_params(pkey)

    # small case: B=2 padded to one 8-row tile, single grid program
    c1 = jax.random.normal(xkey1, (2, 8, IN_DIM), jnp.float32)   # (batch, time, emb)
    out1 = jax.block_until_ready(robust_lstm_forward(c1, params))
    assert out1.shape == (2, OUT_DIM)
    np.testing.assert_allclose(np.asarray(out1),
                               np.asarray(reference_forward(c1, params)),
                               rtol=1e-4, atol=1e-4)

    # exercises the >=2-program grid + padding: B=10 -> tile 8 -> 2 programs
    c2 = jax.random.normal(xkey2, (10, 8, IN_DIM), jnp.float32)
    out2 = jax.block_until_ready(robust_lstm_forward(c2, params))
    assert out2.shape == (10, OUT_DIM)
    np.testing.assert_allclose(np.asarray(out2),
                               np.asarray(reference_forward(c2, params)),
                               rtol=1e-4, atol=1e-4)

    # exercises the tile picker (B=33 -> tile 24, padded to 48 -> 2 programs)
    c3 = jax.random.normal(xkey3, (33, 8, IN_DIM), jnp.float32)
    out3 = jax.block_until_ready(robust_lstm_forward(c3, params))
    assert out3.shape == (33, OUT_DIM)
    np.testing.assert_allclose(np.asarray(out3),
                               np.asarray(reference_forward(c3, params)),
                               rtol=1e-4, atol=1e-4)

    print("KERNEL_OK")
</pallas_src>

<mosaic_0001>
module attributes {stable_mosaic.version = 11 : i64} {
  func.func @robust_lstm_kernel(%arg0: i32, %arg1: memref<8x8x57xf32, #tpu.memory_space<vmem>>, %arg2: memref<57x512xf32, #tpu.memory_space<vmem>>, %arg3: memref<1x512xf32, #tpu.memory_space<vmem>>, %arg4: memref<128x512xf32, #tpu.memory_space<vmem>>, %arg5: memref<128x5xf32, #tpu.memory_space<vmem>>, %arg6: memref<1x5xf32, #tpu.memory_space<vmem>>, %arg7: memref<5x2xf32, #tpu.memory_space<vmem>>, %arg8: memref<1x2xf32, #tpu.memory_space<vmem>>, %arg9: memref<8x2xf32, #tpu.memory_space<vmem>>) attributes {dimension_semantics = [#tpu.dimension_semantics<parallel>], iteration_bounds = array<i64: 1>, scalar_prefetch = 0 : i64, scratch_operands = 0 : i64, tpu.core_type = #tpu.core_type<tc>, window_params = [{transform_indices = @transform_0, window_bounds = array<i64: 8, 8, 57>}, {pipeline_mode = #tpu.pipeline_mode<synchronous>, transform_indices = @transform_1, window_bounds = array<i64: 57, 512>}, {pipeline_mode = #tpu.pipeline_mode<synchronous>, transform_indices = @transform_2, window_bounds = array<i64: 1, 512>}, {pipeline_mode = #tpu.pipeline_mode<synchronous>, transform_indices = @transform_3, window_bounds = array<i64: 128, 512>}, {pipeline_mode = #tpu.pipeline_mode<synchronous>, transform_indices = @transform_4, window_bounds = array<i64: 128, 5>}, {pipeline_mode = #tpu.pipeline_mode<synchronous>, transform_indices = @transform_5, window_bounds = array<i64: 1, 5>}, {pipeline_mode = #tpu.pipeline_mode<synchronous>, transform_indices = @transform_6, window_bounds = array<i64: 5, 2>}, {pipeline_mode = #tpu.pipeline_mode<synchronous>, transform_indices = @transform_7, window_bounds = array<i64: 1, 2>}, {transform_indices = @transform_8, window_bounds = array<i64: 8, 2>}]} {
    %c0 = arith.constant 0 : index
    %c0_0 = arith.constant 0 : index
    %c0_1 = arith.constant 0 : index
    %0 = vector.load %arg1[%c0, %c0_0, %c0_1] : memref<8x8x57xf32, #tpu.memory_space<vmem>>, vector<8x8x57xf32>
    %1 = vector.shape_cast %0 : vector<8x8x57xf32> to vector<64x57xf32>
    %c0_2 = arith.constant 0 : index
    %c0_3 = arith.constant 0 : index
    %2 = vector.load %arg2[%c0_2, %c0_3] : memref<57x512xf32, #tpu.memory_space<vmem>>, vector<57x512xf32>
    %cst = arith.constant dense<0.000000e+00> : vector<64x512xf32>
    %3 = tpu.matmul %1, %2, %cst {dimension_numbers = #tpu.dot_dimension_numbers<[1], [0], [0], [1], [0, 0, 1, 1], [], []>} : vector<64x57xf32>, vector<57x512xf32>, vector<64x512xf32> -> vector<64x512xf32>
    %c0_4 = arith.constant 0 : index
    %c0_5 = arith.constant 0 : index
    %4 = vector.load %arg3[%c0_4, %c0_5] : memref<1x512xf32, #tpu.memory_space<vmem>>, vector<1x512xf32>
    %5 = vector.broadcast %4 : vector<1x512xf32> to vector<64x512xf32>
    %6 = arith.addf %3, %5 : vector<64x512xf32>
    %7 = vector.shape_cast %6 : vector<64x512xf32> to vector<8x8x512xf32>
    %c0_6 = arith.constant 0 : index
    %c0_7 = arith.constant 0 : index
    %8 = vector.load %arg4[%c0_6, %c0_7] : memref<128x512xf32, #tpu.memory_space<vmem>>, vector<128x512xf32>
    %9 = tpu.iota {dimensions = array<i32: 1>} : vector<8x512xi32>
    %c128_i32 = arith.constant 128 : i32
    %c0_i32 = arith.constant 0 : i32
    %10 = arith.cmpi eq, %c128_i32, %c0_i32 : i32
    %c1_i32 = arith.constant 1 : i32
    %11 = arith.select %10, %c1_i32, %c128_i32 : i32
    %12 = vector.broadcast %11 : i32 to vector<8x512xi32>
    %13 = arith.remsi %9, %12 : vector<8x512xi32>
    %c0_i32_8 = arith.constant 0 : i32
    %14 = vector.broadcast %c0_i32_8 : i32 to vector<8x512xi32>
    %15 = arith.cmpi ne, %13, %14 : vector<8x512xi32>
    %c0_i32_9 = arith.constant 0 : i32
    %16 = vector.broadcast %c0_i32_9 : i32 to vector<8x512xi32>
    %17 = arith.cmpi slt, %13, %16 : vector<8x512xi32>
    %c0_i32_10 = arith.constant 0 : i32
    %18 = arith.cmpi slt, %11, %c0_i32_10 : i32
    %19 = vector.broadcast %18 : i1 to vector<8x512xi1>
    %20 = vector.broadcast %19 : vector<8x512xi1> to vector<8x512xi1>
    %21 = arith.xori %17, %20 : vector<8x512xi1>
    %22 = arith.andi %21, %15 : vector<8x512xi1>
    %23 = vector.broadcast %11 : i32 to vector<8x512xi32>
    %24 = arith.addi %13, %23 : vector<8x512xi32>
    %25 = arith.select %22, %24, %13 : vector<8x512xi1>, vector<8x512xi32>
    %c64_i32 = arith.constant 64 : i32
    %26 = vector.broadcast %c64_i32 : i32 to vector<8x512xi32>
    %27 = arith.cmpi slt, %25, %26 : vector<8x512xi32>
    %cst_11 = arith.constant 0.000000e+00 : f32
    %28 = vector.broadcast %cst_11 : f32 to vector<8x128xf32>
    %cst_12 = arith.constant 0.000000e+00 : f32
    %29 = vector.broadcast %cst_12 : f32 to vector<8x128xf32>
    %30 = vector.extract_strided_slice %7 {offsets = [0, 0, 0], sizes = [1, 8, 512], strides = [1, 1, 1]} : vector<8x8x512xf32> to vector<1x8x512xf32>
    %31 = vector.shape_cast %30 : vector<1x8x512xf32> to vector<8x512xf32>
    %32 = vector.extract_strided_slice %7 {offsets = [7, 0, 0], sizes = [1, 8, 512], strides = [1, 1, 1]} : vector<8x8x512xf32> to vector<1x8x512xf32>
    %33 = vector.shape_cast %32 : vector<1x8x512xf32> to vector<8x512xf32>
    %34 = arith.select %27, %31, %33 : vector<8x512xi1>, vector<8x512xf32>
    %cst_13 = arith.constant dense<0.000000e+00> : vector<8x512xf32>
    %35 = tpu.matmul %28, %8, %cst_13 {dimension_numbers = #tpu.dot_dimension_numbers<[1], [0], [0], [1], [0, 0, 1, 1], [], []>} : vector<8x128xf32>, vector<128x512xf32>, vector<8x512xf32> -> vector<8x512xf32>
    %36 = arith.addf %34, %35 : vector<8x512xf32>
    %37 = vector.extract_strided_slice %36 {offsets = [0, 0], sizes = [8, 128], strides = [1, 1]} : vector<8x512xf32> to vector<8x128xf32>
    %cst_14 = arith.constant 5.000000e-01 : f32
    %38 = vector.broadcast %cst_14 : f32 to vector<8x128xf32>
    %39 = arith.mulf %38, %37 : vector<8x128xf32>
    %40 = math.tanh %39 : vector<8x128xf32>
    %cst_15 = arith.constant 5.000000e-01 : f32
    %41 = vector.broadcast %cst_15 : f32 to vector<8x128xf32>
    %42 = arith.mulf %41, %40 : vector<8x128xf32>
    %cst_16 = arith.constant 5.000000e-01 : f32
    %43 = vector.broadcast %cst_16 : f32 to vector<8x128xf32>
    %44 = arith.addf %42, %43 : vector<8x128xf32>
    %45 = vector.extract_strided_slice %36 {offsets = [0, 128], sizes = [8, 128], strides = [1, 1]} : vector<8x512xf32> to vector<8x128xf32>
    %cst_17 = arith.constant 5.000000e-01 : f32
    %46 = vector.broadcast %cst_17 : f32 to vector<8x128xf32>
    %47 = arith.mulf %46, %45 : vector<8x128xf32>
    %48 = math.tanh %47 : vector<8x128xf32>
    %cst_18 = arith.constant 5.000000e-01 : f32
    %49 = vector.broadcast %cst_18 : f32 to vector<8x128xf32>
    %50 = arith.mulf %49, %48 : vector<8x128xf32>
    %cst_19 = arith.constant 5.000000e-01 : f32
    %51 = vector.broadcast %cst_19 : f32 to vector<8x128xf32>
    %52 = arith.addf %50, %51 : vector<8x128xf32>
    %53 = vector.extract_strided_slice %36 {offsets = [0, 256], sizes = [8, 128], strides = [1, 1]} : vector<8x512xf32> to vector<8x128xf32>
    %54 = math.tanh %53 : vector<8x128xf32>
    %55 = vector.extract_strided_slice %36 {offsets = [0, 384], sizes = [8, 128], strides = [1, 1]} : vector<8x512xf32> to vector<8x128xf32>
    %cst_20 = arith.constant 5.000000e-01 : f32
    %56 = vector.broadcast %cst_20 : f32 to vector<8x128xf32>
    %57 = arith.mulf %56, %55 : vector<8x128xf32>
    %58 = math.tanh %57 : vector<8x128xf32>
    %cst_21 = arith.constant 5.000000e-01 : f32
    %59 = vector.broadcast %cst_21 : f32 to vector<8x128xf32>
    %60 = arith.mulf %59, %58 : vector<8x128xf32>
    %cst_22 = arith.constant 5.000000e-01 : f32
    %61 = vector.broadcast %cst_22 : f32 to vector<8x128xf32>
    %62 = arith.addf %60, %61 : vector<8x128xf32>
    %63 = arith.mulf %52, %29 : vector<8x128xf32>
    %64 = arith.mulf %44, %54 : vector<8x128xf32>
    %65 = arith.addf %63, %64 : vector<8x128xf32>
    %66 = math.tanh %65 : vector<8x128xf32>
    %67 = arith.mulf %62, %66 : vector<8x128xf32>
    %68 = vector.extract_strided_slice %7 {offsets = [1, 0, 0], sizes = [1, 8, 512], strides = [1, 1, 1]} : vector<8x8x512xf32> to vector<1x8x512xf32>
    %69 = vector.shape_cast %68 : vector<1x8x512xf32> to vector<8x512xf32>
    %70 = vector.extract_strided_slice %7 {offsets = [6, 0, 0], sizes = [1, 8, 512], strides = [1, 1, 1]} : vector<8x8x512xf32> to vector<1x8x512xf32>
    %71 = vector.shape_cast %70 : vector<1x8x512xf32> to vector<8x512xf32>
    %72 = arith.select %27, %69, %71 : vector<8x512xi1>, vector<8x512xf32>
    %cst_23 = arith.constant dense<0.000000e+00> : vector<8x512xf32>
    %73 = tpu.matmul %67, %8, %cst_23 {dimension_numbers = #tpu.dot_dimension_numbers<[1], [0], [0], [1], [0, 0, 1, 1], [], []>} : vector<8x128xf32>, vector<128x512xf32>, vector<8x512xf32> -> vector<8x512xf32>
    %74 = arith.addf %72, %73 : vector<8x512xf32>
    %75 = vector.extract_strided_slice %74 {offsets = [0, 0], sizes = [8, 128], strides = [1, 1]} : vector<8x512xf32> to vector<8x128xf32>
    %cst_24 = arith.constant 5.000000e-01 : f32
    %76 = vector.broadcast %cst_24 : f32 to vector<8x128xf32>
    %77 = arith.mulf %76, %75 : vector<8x128xf32>
    %78 = math.tanh %77 : vector<8x128xf32>
    %cst_25 = arith.constant 5.000000e-01 : f32
    %79 = vector.broadcast %cst_25 : f32 to vector<8x128xf32>
    %80 = arith.mulf %79, %78 : vector<8x128xf32>
    %cst_26 = arith.constant 5.000000e-01 : f32
    %81 = vector.broadcast %cst_26 : f32 to vector<8x128xf32>
    %82 = arith.addf %80, %81 : vector<8x128xf32>
    %83 = vector.extract_strided_slice %74 {offsets = [0, 128], sizes = [8, 128], strides = [1, 1]} : vector<8x512xf32> to vector<8x128xf32>
    %cst_27 = arith.constant 5.000000e-01 : f32
    %84 = vector.broadcast %cst_27 : f32 to vector<8x128xf32>
    %85 = arith.mulf %84, %83 : vector<8x128xf32>
    %86 = math.tanh %85 : vector<8x128xf32>
    %cst_28 = arith.constant 5.000000e-01 : f32
    %87 = vector.broadcast %cst_28 : f32 to vector<8x128xf32>
    %88 = arith.mulf %87, %86 : vector<8x128xf32>
    %cst_29 = arith.constant 5.000000e-01 : f32
    %89 = vector.broadcast %cst_29 : f32 to vector<8x128xf32>
    %90 = arith.addf %88, %89 : vector<8x128xf32>
    %91 = vector.extract_strided_slice %74 {offsets = [0, 256], sizes = [8, 128], strides = [1, 1]} : vector<8x512xf32> to vector<8x128xf32>
    %92 = math.tanh %91 : vector<8x128xf32>
    %93 = vector.extract_strided_slice %74 {offsets = [0, 384], sizes = [8, 128], strides = [1, 1]} : vector<8x512xf32> to vector<8x128xf32>
    %cst_30 = arith.constant 5.000000e-01 : f32
    %94 = vector.broadcast %cst_30 : f32 to vector<8x128xf32>
    %95 = arith.mulf %94, %93 : vector<8x128xf32>
    %96 = math.tanh %95 : vector<8x128xf32>
    %cst_31 = arith.constant 5.000000e-01 : f32
    %97 = vector.broadcast %cst_31 : f32 to vector<8x128xf32>
    %98 = arith.mulf %97, %96 : vector<8x128xf32>
    %cst_32 = arith.constant 5.000000e-01 : f32
    %99 = vector.broadcast %cst_32 : f32 to vector<8x128xf32>
    %100 = arith.addf %98, %99 : vector<8x128xf32>
    %101 = arith.mulf %90, %65 : vector<8x128xf32>
    %102 = arith.mulf %82, %92 : vector<8x128xf32>
    %103 = arith.addf %101, %102 : vector<8x128xf32>
    %104 = math.tanh %103 : vector<8x128xf32>
    %105 = arith.mulf %100, %104 : vector<8x128xf32>
    %106 = vector.extract_strided_slice %7 {offsets = [2, 0, 0], sizes = [1, 8, 512], strides = [1, 1, 1]} : vector<8x8x512xf32> to vector<1x8x512xf32>
    %107 = vector.shape_cast %106 : vector<1x8x512xf32> to vector<8x512xf32>
    %108 = vector.extract_strided_slice %7 {offsets = [5, 0, 0], sizes = [1, 8, 512], strides = [1, 1, 1]} : vector<8x8x512xf32> to vector<1x8x512xf32>
    %109 = vector.shape_cast %108 : vector<1x8x512xf32> to vector<8x512xf32>
    %110 = arith.select %27, %107, %109 : vector<8x512xi1>, vector<8x512xf32>
    %cst_33 = arith.constant dense<0.000000e+00> : vector<8x512xf32>
    %111 = tpu.matmul %105, %8, %cst_33 {dimension_numbers = #tpu.dot_dimension_numbers<[1], [0], [0], [1], [0, 0, 1, 1], [], []>} : vector<8x128xf32>, vector<128x512xf32>, vector<8x512xf32> -> vector<8x512xf32>
    %112 = arith.addf %110, %111 : vector<8x512xf32>
    %113 = vector.extract_strided_slice %112 {offsets = [0, 0], sizes = [8, 128], strides = [1, 1]} : vector<8x512xf32> to vector<8x128xf32>
    %cst_34 = arith.constant 5.000000e-01 : f32
    %114 = vector.broadcast %cst_34 : f32 to vector<8x128xf32>
    %115 = arith.mulf %114, %113 : vector<8x128xf32>
    %116 = math.tanh %115 : vector<8x128xf32>
    %cst_35 = arith.constant 5.000000e-01 : f32
    %117 = vector.broadcast %cst_35 : f32 to vector<8x128xf32>
    %118 = arith.mulf %117, %116 : vector<8x128xf32>
    %cst_36 = arith.constant 5.000000e-01 : f32
    %119 = vector.broadcast %cst_36 : f32 to vector<8x128xf32>
    %120 = arith.addf %118, %119 : vector<8x128xf32>
    %121 = vector.extract_strided_slice %112 {offsets = [0, 128], sizes = [8, 128], strides = [1, 1]} : vector<8x512xf32> to vector<8x128xf32>
    %cst_37 = arith.constant 5.000000e-01 : f32
    %122 = vector.broadcast %cst_37 : f32 to vector<8x128xf32>
    %123 = arith.mulf %122, %121 : vector<8x128xf32>
    %124 = math.tanh %123 : vector<8x128xf32>
    %cst_38 = arith.constant 5.000000e-01 : f32
    %125 = vector.broadcast %cst_38 : f32 to vector<8x128xf32>
    %126 = arith.mulf %125, %124 : vector<8x128xf32>
    %cst_39 = arith.constant 5.000000e-01 : f32
    %127 = vector.broadcast %cst_39 : f32 to vector<8x128xf32>
    %128 = arith.addf %126, %127 : vector<8x128xf32>
    %129 = vector.extract_strided_slice %112 {offsets = [0, 256], sizes = [8, 128], strides = [1, 1]} : vector<8x512xf32> to vector<8x128xf32>
    %130 = math.tanh %129 : vector<8x128xf32>
    %131 = vector.extract_strided_slice %112 {offsets = [0, 384], sizes = [8, 128], strides = [1, 1]} : vector<8x512xf32> to vector<8x128xf32>
    %cst_40 = arith.constant 5.000000e-01 : f32
    %132 = vector.broadcast %cst_40 : f32 to vector<8x128xf32>
    %133 = arith.mulf %132, %131 : vector<8x128xf32>
    %134 = math.tanh %133 : vector<8x128xf32>
    %cst_41 = arith.constant 5.000000e-01 : f32
    %135 = vector.broadcast %cst_41 : f32 to vector<8x128xf32>
    %136 = arith.mulf %135, %134 : vector<8x128xf32>
    %cst_42 = arith.constant 5.000000e-01 : f32
    %137 = vector.broadcast %cst_42 : f32 to vector<8x128xf32>
    %138 = arith.addf %136, %137 : vector<8x128xf32>
    %139 = arith.mulf %128, %103 : vector<8x128xf32>
    %140 = arith.mulf %120, %130 : vector<8x128xf32>
    %141 = arith.addf %139, %140 : vector<8x128xf32>
    %142 = math.tanh %141 : vector<8x128xf32>
    %143 = arith.mulf %138, %142 : vector<8x128xf32>
    %144 = vector.extract_strided_slice %7 {offsets = [3, 0, 0], sizes = [1, 8, 512], strides = [1, 1, 1]} : vector<8x8x512xf32> to vector<1x8x512xf32>
    %145 = vector.shape_cast %144 : vector<1x8x512xf32> to vector<8x512xf32>
    %146 = vector.extract_strided_slice %7 {offsets = [4, 0, 0], sizes = [1, 8, 512], strides = [1, 1, 1]} : vector<8x8x512xf32> to vector<1x8x512xf32>
    %147 = vector.shape_cast %146 : vector<1x8x512xf32> to vector<8x512xf32>
    %148 = arith.select %27, %145, %147 : vector<8x512xi1>, vector<8x512xf32>
    %cst_43 = arith.constant dense<0.000000e+00> : vector<8x512xf32>
    %149 = tpu.matmul %143, %8, %cst_43 {dimension_numbers = #tpu.dot_dimension_numbers<[1], [0], [0], [1], [0, 0, 1, 1], [], []>} : vector<8x128xf32>, vector<128x512xf32>, vector<8x512xf32> -> vector<8x512xf32>
    %150 = arith.addf %148, %149 : vector<8x512xf32>
    %151 = vector.extract_strided_slice %150 {offsets = [0, 0], sizes = [8, 128], strides = [1, 1]} : vector<8x512xf32> to vector<8x128xf32>
    %cst_44 = arith.constant 5.000000e-01 : f32
    %152 = vector.broadcast %cst_44 : f32 to vector<8x128xf32>
    %153 = arith.mulf %152, %151 : vector<8x128xf32>
    %154 = math.tanh %153 : vector<8x128xf32>
    %cst_45 = arith.constant 5.000000e-01 : f32
    %155 = vector.broadcast %cst_45 : f32 to vector<8x128xf32>
    %156 = arith.mulf %155, %154 : vector<8x128xf32>
    %cst_46 = arith.constant 5.000000e-01 : f32
    %157 = vector.broadcast %cst_46 : f32 to vector<8x128xf32>
    %158 = arith.addf %156, %157 : vector<8x128xf32>
    %159 = vector.extract_strided_slice %150 {offsets = [0, 128], sizes = [8, 128], strides = [1, 1]} : vector<8x512xf32> to vector<8x128xf32>
    %cst_47 = arith.constant 5.000000e-01 : f32
    %160 = vector.broadcast %cst_47 : f32 to vector<8x128xf32>
    %161 = arith.mulf %160, %159 : vector<8x128xf32>
    %162 = math.tanh %161 : vector<8x128xf32>
    %cst_48 = arith.constant 5.000000e-01 : f32
    %163 = vector.broadcast %cst_48 : f32 to vector<8x128xf32>
    %164 = arith.mulf %163, %162 : vector<8x128xf32>
    %cst_49 = arith.constant 5.000000e-01 : f32
    %165 = vector.broadcast %cst_49 : f32 to vector<8x128xf32>
    %166 = arith.addf %164, %165 : vector<8x128xf32>
    %167 = vector.extract_strided_slice %150 {offsets = [0, 256], sizes = [8, 128], strides = [1, 1]} : vector<8x512xf32> to vector<8x128xf32>
    %168 = math.tanh %167 : vector<8x128xf32>
    %169 = vector.extract_strided_slice %150 {offsets = [0, 384], sizes = [8, 128], strides = [1, 1]} : vector<8x512xf32> to vector<8x128xf32>
    %cst_50 = arith.constant 5.000000e-01 : f32
    %170 = vector.broadcast %cst_50 : f32 to vector<8x128xf32>
    %171 = arith.mulf %170, %169 : vector<8x128xf32>
    %172 = math.tanh %171 : vector<8x128xf32>
    %cst_51 = arith.constant 5.000000e-01 : f32
    %173 = vector.broadcast %cst_51 : f32 to vector<8x128xf32>
    %174 = arith.mulf %173, %172 : vector<8x128xf32>
    %cst_52 = arith.constant 5.000000e-01 : f32
    %175 = vector.broadcast %cst_52 : f32 to vector<8x128xf32>
    %176 = arith.addf %174, %175 : vector<8x128xf32>
    %177 = arith.mulf %166, %141 : vector<8x128xf32>
    %178 = arith.mulf %158, %168 : vector<8x128xf32>
    %179 = arith.addf %177, %178 : vector<8x128xf32>
    %180 = math.tanh %179 : vector<8x128xf32>
    %181 = arith.mulf %176, %180 : vector<8x128xf32>
    %182 = vector.extract_strided_slice %7 {offsets = [4, 0, 0], sizes = [1, 8, 512], strides = [1, 1, 1]} : vector<8x8x512xf32> to vector<1x8x512xf32>
    %183 = vector.shape_cast %182 : vector<1x8x512xf32> to vector<8x512xf32>
    %184 = vector.extract_strided_slice %7 {offsets = [3, 0, 0], sizes = [1, 8, 512], strides = [1, 1, 1]} : vector<8x8x512xf32> to vector<1x8x512xf32>
    %185 = vector.shape_cast %184 : vector<1x8x512xf32> to vector<8x512xf32>
    %186 = arith.select %27, %183, %185 : vector<8x512xi1>, vector<8x512xf32>
    %cst_53 = arith.constant dense<0.000000e+00> : vector<8x512xf32>
    %187 = tpu.matmul %181, %8, %cst_53 {dimension_numbers = #tpu.dot_dimension_numbers<[1], [0], [0], [1], [0, 0, 1, 1], [], []>} : vector<8x128xf32>, vector<128x512xf32>, vector<8x512xf32> -> vector<8x512xf32>
    %188 = arith.addf %186, %187 : vector<8x512xf32>
    %189 = vector.extract_strided_slice %188 {offsets = [0, 0], sizes = [8, 128], strides = [1, 1]} : vector<8x512xf32> to vector<8x128xf32>
    %cst_54 = arith.constant 5.000000e-01 : f32
    %190 = vector.broadcast %cst_54 : f32 to vector<8x128xf32>
    %191 = arith.mulf %190, %189 : vector<8x128xf32>
    %192 = math.tanh %191 : vector<8x128xf32>
    %cst_55 = arith.constant 5.000000e-01 : f32
    %193 = vector.broadcast %cst_55 : f32 to vector<8x128xf32>
    %194 = arith.mulf %193, %192 : vector<8x128xf32>
    %cst_56 = arith.constant 5.000000e-01 : f32
    %195 = vector.broadcast %cst_56 : f32 to vector<8x128xf32>
    %196 = arith.addf %194, %195 : vector<8x128xf32>
    %197 = vector.extract_strided_slice %188 {offsets = [0, 128], sizes = [8, 128], strides = [1, 1]} : vector<8x512xf32> to vector<8x128xf32>
    %cst_57 = arith.constant 5.000000e-01 : f32
    %198 = vector.broadcast %cst_57 : f32 to vector<8x128xf32>
    %199 = arith.mulf %198, %197 : vector<8x128xf32>
    %200 = math.tanh %199 : vector<8x128xf32>
    %cst_58 = arith.constant 5.000000e-01 : f32
    %201 = vector.broadcast %cst_58 : f32 to vector<8x128xf32>
    %202 = arith.mulf %201, %200 : vector<8x128xf32>
    %cst_59 = arith.constant 5.000000e-01 : f32
    %203 = vector.broadcast %cst_59 : f32 to vector<8x128xf32>
    %204 = arith.addf %202, %203 : vector<8x128xf32>
    %205 = vector.extract_strided_slice %188 {offsets = [0, 256], sizes = [8, 128], strides = [1, 1]} : vector<8x512xf32> to vector<8x128xf32>
    %206 = math.tanh %205 : vector<8x128xf32>
    %207 = vector.extract_strided_slice %188 {offsets = [0, 384], sizes = [8, 128], strides = [1, 1]} : vector<8x512xf32> to vector<8x128xf32>
    %cst_60 = arith.constant 5.000000e-01 : f32
    %208 = vector.broadcast %cst_60 : f32 to vector<8x128xf32>
    %209 = arith.mulf %208, %207 : vector<8x128xf32>
    %210 = math.tanh %209 : vector<8x128xf32>
    %cst_61 = arith.constant 5.000000e-01 : f32
    %211 = vector.broadcast %cst_61 : f32 to vector<8x128xf32>
    %212 = arith.mulf %211, %210 : vector<8x128xf32>
    %cst_62 = arith.constant 5.000000e-01 : f32
    %213 = vector.broadcast %cst_62 : f32 to vector<8x128xf32>
    %214 = arith.addf %212, %213 : vector<8x128xf32>
    %215 = arith.mulf %204, %179 : vector<8x128xf32>
    %216 = arith.mulf %196, %206 : vector<8x128xf32>
    %217 = arith.addf %215, %216 : vector<8x128xf32>
    %218 = math.tanh %217 : vector<8x128xf32>
    %219 = arith.mulf %214, %218 : vector<8x128xf32>
    %220 = vector.extract_strided_slice %7 {offsets = [5, 0, 0], sizes = [1, 8, 512], strides = [1, 1, 1]} : vector<8x8x512xf32> to vector<1x8x512xf32>
    %221 = vector.shape_cast %220 : vector<1x8x512xf32> to vector<8x512xf32>
    %222 = vector.extract_strided_slice %7 {offsets = [2, 0, 0], sizes = [1, 8, 512], strides = [1, 1, 1]} : vector<8x8x512xf32> to vector<1x8x512xf32>
    %223 = vector.shape_cast %222 : vector<1x8x512xf32> to vector<8x512xf32>
    %224 = arith.select %27, %221, %223 : vector<8x512xi1>, vector<8x512xf32>
    %cst_63 = arith.constant dense<0.000000e+00> : vector<8x512xf32>
    %225 = tpu.matmul %219, %8, %cst_63 {dimension_numbers = #tpu.dot_dimension_numbers<[1], [0], [0], [1], [0, 0, 1, 1], [], []>} : vector<8x128xf32>, vector<128x512xf32>, vector<8x512xf32> -> vector<8x512xf32>
    %226 = arith.addf %224, %225 : vector<8x512xf32>
    %227 = vector.extract_strided_slice %226 {offsets = [0, 0], sizes = [8, 128], strides = [1, 1]} : vector<8x512xf32> to vector<8x128xf32>
    %cst_64 = arith.constant 5.000000e-01 : f32
    %228 = vector.broadcast %cst_64 : f32 to vector<8x128xf32>
    %229 = arith.mulf %228, %227 : vector<8x128xf32>
    %230 = math.tanh %229 : vector<8x128xf32>
    %cst_65 = arith.constant 5.000000e-01 : f32
    %231 = vector.broadcast %cst_65 : f32 to vector<8x128xf32>
    %232 = arith.mulf %231, %230 : vector<8x128xf32>
    %cst_66 = arith.constant 5.000000e-01 : f32
    %233 = vector.broadcast %cst_66 : f32 to vector<8x128xf32>
    %234 = arith.addf %232, %233 : vector<8x128xf32>
    %235 = vector.extract_strided_slice %226 {offsets = [0, 128], sizes = [8, 128], strides = [1, 1]} : vector<8x512xf32> to vector<8x128xf32>
    %cst_67 = arith.constant 5.000000e-01 : f32
    %236 = vector.broadcast %cst_67 : f32 to vector<8x128xf32>
    %237 = arith.mulf %236, %235 : vector<8x128xf32>
    %238 = math.tanh %237 : vector<8x128xf32>
    %cst_68 = arith.constant 5.000000e-01 : f32
    %239 = vector.broadcast %cst_68 : f32 to vector<8x128xf32>
    %240 = arith.mulf %239, %238 : vector<8x128xf32>
    %cst_69 = arith.constant 5.000000e-01 : f32
    %241 = vector.broadcast %cst_69 : f32 to vector<8x128xf32>
    %242 = arith.addf %240, %241 : vector<8x128xf32>
    %243 = vector.extract_strided_slice %226 {offsets = [0, 256], sizes = [8, 128], strides = [1, 1]} : vector<8x512xf32> to vector<8x128xf32>
    %244 = math.tanh %243 : vector<8x128xf32>
    %245 = vector.extract_strided_slice %226 {offsets = [0, 384], sizes = [8, 128], strides = [1, 1]} : vector<8x512xf32> to vector<8x128xf32>
    %cst_70 = arith.constant 5.000000e-01 : f32
    %246 = vector.broadcast %cst_70 : f32 to vector<8x128xf32>
    %247 = arith.mulf %246, %245 : vector<8x128xf32>
    %248 = math.tanh %247 : vector<8x128xf32>
    %cst_71 = arith.constant 5.000000e-01 : f32
    %249 = vector.broadcast %cst_71 : f32 to vector<8x128xf32>
    %250 = arith.mulf %249, %248 : vector<8x128xf32>
    %cst_72 = arith.constant 5.000000e-01 : f32
    %251 = vector.broadcast %cst_72 : f32 to vector<8x128xf32>
    %252 = arith.addf %250, %251 : vector<8x128xf32>
    %253 = arith.mulf %242, %217 : vector<8x128xf32>
    %254 = arith.mulf %234, %244 : vector<8x128xf32>
    %255 = arith.addf %253, %254 : vector<8x128xf32>
    %256 = math.tanh %255 : vector<8x128xf32>
    %257 = arith.mulf %252, %256 : vector<8x128xf32>
    %258 = vector.extract_strided_slice %7 {offsets = [6, 0, 0], sizes = [1, 8, 512], strides = [1, 1, 1]} : vector<8x8x512xf32> to vector<1x8x512xf32>
    %259 = vector.shape_cast %258 : vector<1x8x512xf32> to vector<8x512xf32>
    %260 = vector.extract_strided_slice %7 {offsets = [1, 0, 0], sizes = [1, 8, 512], strides = [1, 1, 1]} : vector<8x8x512xf32> to vector<1x8x512xf32>
    %261 = vector.shape_cast %260 : vector<1x8x512xf32> to vector<8x512xf32>
    %262 = arith.select %27, %259, %261 : vector<8x512xi1>, vector<8x512xf32>
    %cst_73 = arith.constant dense<0.000000e+00> : vector<8x512xf32>
    %263 = tpu.matmul %257, %8, %cst_73 {dimension_numbers = #tpu.dot_dimension_numbers<[1], [0], [0], [1], [0, 0, 1, 1], [], []>} : vector<8x128xf32>, vector<128x512xf32>, vector<8x512xf32> -> vector<8x512xf32>
    %264 = arith.addf %262, %263 : vector<8x512xf32>
    %265 = vector.extract_strided_slice %264 {offsets = [0, 0], sizes = [8, 128], strides = [1, 1]} : vector<8x512xf32> to vector<8x128xf32>
    %cst_74 = arith.constant 5.000000e-01 : f32
    %266 = vector.broadcast %cst_74 : f32 to vector<8x128xf32>
    %267 = arith.mulf %266, %265 : vector<8x128xf32>
    %268 = math.tanh %267 : vector<8x128xf32>
    %cst_75 = arith.constant 5.000000e-01 : f32
    %269 = vector.broadcast %cst_75 : f32 to vector<8x128xf32>
    %270 = arith.mulf %269, %268 : vector<8x128xf32>
    %cst_76 = arith.constant 5.000000e-01 : f32
    %271 = vector.broadcast %cst_76 : f32 to vector<8x128xf32>
    %272 = arith.addf %270, %271 : vector<8x128xf32>
    %273 = vector.extract_strided_slice %264 {offsets = [0, 128], sizes = [8, 128], strides = [1, 1]} : vector<8x512xf32> to vector<8x128xf32>
    %cst_77 = arith.constant 5.000000e-01 : f32
    %274 = vector.broadcast %cst_77 : f32 to vector<8x128xf32>
    %275 = arith.mulf %274, %273 : vector<8x128xf32>
    %276 = math.tanh %275 : vector<8x128xf32>
    %cst_78 = arith.constant 5.000000e-01 : f32
    %277 = vector.broadcast %cst_78 : f32 to vector<8x128xf32>
    %278 = arith.mulf %277, %276 : vector<8x128xf32>
    %cst_79 = arith.constant 5.000000e-01 : f32
    %279 = vector.broadcast %cst_79 : f32 to vector<8x128xf32>
    %280 = arith.addf %278, %279 : vector<8x128xf32>
    %281 = vector.extract_strided_slice %264 {offsets = [0, 256], sizes = [8, 128], strides = [1, 1]} : vector<8x512xf32> to vector<8x128xf32>
    %282 = math.tanh %281 : vector<8x128xf32>
    %283 = vector.extract_strided_slice %264 {offsets = [0, 384], sizes = [8, 128], strides = [1, 1]} : vector<8x512xf32> to vector<8x128xf32>
    %cst_80 = arith.constant 5.000000e-01 : f32
    %284 = vector.broadcast %cst_80 : f32 to vector<8x128xf32>
    %285 = arith.mulf %284, %283 : vector<8x128xf32>
    %286 = math.tanh %285 : vector<8x128xf32>
    %cst_81 = arith.constant 5.000000e-01 : f32
    %287 = vector.broadcast %cst_81 : f32 to vector<8x128xf32>
    %288 = arith.mulf %287, %286 : vector<8x128xf32>
    %cst_82 = arith.constant 5.000000e-01 : f32
    %289 = vector.broadcast %cst_82 : f32 to vector<8x128xf32>
    %290 = arith.addf %288, %289 : vector<8x128xf32>
    %291 = arith.mulf %280, %255 : vector<8x128xf32>
    %292 = arith.mulf %272, %282 : vector<8x128xf32>
    %293 = arith.addf %291, %292 : vector<8x128xf32>
    %294 = math.tanh %293 : vector<8x128xf32>
    %295 = arith.mulf %290, %294 : vector<8x128xf32>
    %296 = vector.extract_strided_slice %7 {offsets = [7, 0, 0], sizes = [1, 8, 512], strides = [1, 1, 1]} : vector<8x8x512xf32> to vector<1x8x512xf32>
    %297 = vector.shape_cast %296 : vector<1x8x512xf32> to vector<8x512xf32>
    %298 = vector.extract_strided_slice %7 {offsets = [0, 0, 0], sizes = [1, 8, 512], strides = [1, 1, 1]} : vector<8x8x512xf32> to vector<1x8x512xf32>
    %299 = vector.shape_cast %298 : vector<1x8x512xf32> to vector<8x512xf32>
    %300 = arith.select %27, %297, %299 : vector<8x512xi1>, vector<8x512xf32>
    %cst_83 = arith.constant dense<0.000000e+00> : vector<8x512xf32>
    %301 = tpu.matmul %295, %8, %cst_83 {dimension_numbers = #tpu.dot_dimension_numbers<[1], [0], [0], [1], [0, 0, 1, 1], [], []>} : vector<8x128xf32>, vector<128x512xf32>, vector<8x512xf32> -> vector<8x512xf32>
    %302 = arith.addf %300, %301 : vector<8x512xf32>
    %303 = vector.extract_strided_slice %302 {offsets = [0, 0], sizes = [8, 128], strides = [1, 1]} : vector<8x512xf32> to vector<8x128xf32>
    %cst_84 = arith.constant 5.000000e-01 : f32
    %304 = vector.broadcast %cst_84 : f32 to vector<8x128xf32>
    %305 = arith.mulf %304, %303 : vector<8x128xf32>
    %306 = math.tanh %305 : vector<8x128xf32>
    %cst_85 = arith.constant 5.000000e-01 : f32
    %307 = vector.broadcast %cst_85 : f32 to vector<8x128xf32>
    %308 = arith.mulf %307, %306 : vector<8x128xf32>
    %cst_86 = arith.constant 5.000000e-01 : f32
    %309 = vector.broadcast %cst_86 : f32 to vector<8x128xf32>
    %310 = arith.addf %308, %309 : vector<8x128xf32>
    %311 = vector.extract_strided_slice %302 {offsets = [0, 128], sizes = [8, 128], strides = [1, 1]} : vector<8x512xf32> to vector<8x128xf32>
    %cst_87 = arith.constant 5.000000e-01 : f32
    %312 = vector.broadcast %cst_87 : f32 to vector<8x128xf32>
    %313 = arith.mulf %312, %311 : vector<8x128xf32>
    %314 = math.tanh %313 : vector<8x128xf32>
    %cst_88 = arith.constant 5.000000e-01 : f32
    %315 = vector.broadcast %cst_88 : f32 to vector<8x128xf32>
    %316 = arith.mulf %315, %314 : vector<8x128xf32>
    %cst_89 = arith.constant 5.000000e-01 : f32
    %317 = vector.broadcast %cst_89 : f32 to vector<8x128xf32>
    %318 = arith.addf %316, %317 : vector<8x128xf32>
    %319 = vector.extract_strided_slice %302 {offsets = [0, 256], sizes = [8, 128], strides = [1, 1]} : vector<8x512xf32> to vector<8x128xf32>
    %320 = math.tanh %319 : vector<8x128xf32>
    %321 = vector.extract_strided_slice %302 {offsets = [0, 384], sizes = [8, 128], strides = [1, 1]} : vector<8x512xf32> to vector<8x128xf32>
    %cst_90 = arith.constant 5.000000e-01 : f32
    %322 = vector.broadcast %cst_90 : f32 to vector<8x128xf32>
    %323 = arith.mulf %322, %321 : vector<8x128xf32>
    %324 = math.tanh %323 : vector<8x128xf32>
    %cst_91 = arith.constant 5.000000e-01 : f32
    %325 = vector.broadcast %cst_91 : f32 to vector<8x128xf32>
    %326 = arith.mulf %325, %324 : vector<8x128xf32>
    %cst_92 = arith.constant 5.000000e-01 : f32
    %327 = vector.broadcast %cst_92 : f32 to vector<8x128xf32>
    %328 = arith.addf %326, %327 : vector<8x128xf32>
    %329 = arith.mulf %318, %293 : vector<8x128xf32>
    %330 = arith.mulf %310, %320 : vector<8x128xf32>
    %331 = arith.addf %329, %330 : vector<8x128xf32>
    %332 = math.tanh %331 : vector<8x128xf32>
    %333 = arith.mulf %328, %332 : vector<8x128xf32>
    %c0_93 = arith.constant 0 : index
    %c0_94 = arith.constant 0 : index
    %334 = vector.load %arg5[%c0_93, %c0_94] : memref<128x5xf32, #tpu.memory_space<vmem>>, vector<128x5xf32>
    %cst_95 = arith.constant dense<0.000000e+00> : vector<8x5xf32>
    %335 = tpu.matmul %333, %334, %cst_95 {dimension_numbers = #tpu.dot_dimension_numbers<[1], [0], [0], [1], [0, 0, 1, 1], [], []>} : vector<8x128xf32>, vector<128x5xf32>, vector<8x5xf32> -> vector<8x5xf32>
    %c0_96 = arith.constant 0 : index
    %c0_97 = arith.constant 0 : index
    %336 = vector.load %arg6[%c0_96, %c0_97] : memref<1x5xf32, #tpu.memory_space<vmem>>, vector<1x5xf32>
    %337 = vector.broadcast %336 : vector<1x5xf32> to vector<8x5xf32>
    %338 = arith.addf %335, %337 : vector<8x5xf32>
    %cst_98 = arith.constant 0.000000e+00 : f32
    %339 = vector.broadcast %cst_98 : f32 to vector<8x5xf32>
    %340 = arith.maximumf %338, %339 : vector<8x5xf32>
    %c0_99 = arith.constant 0 : index
    %c0_100 = arith.constant 0 : index
    %341 = vector.load %arg7[%c0_99, %c0_100] : memref<5x2xf32, #tpu.memory_space<vmem>>, vector<5x2xf32>
    %cst_101 = arith.constant dense<0.000000e+00> : vector<8x2xf32>
    %342 = tpu.matmul %340, %341, %cst_101 {dimension_numbers = #tpu.dot_dimension_numbers<[1], [0], [0], [1], [0, 0, 1, 1], [], []>} : vector<8x5xf32>, vector<5x2xf32>, vector<8x2xf32> -> vector<8x2xf32>
    %c0_102 = arith.constant 0 : index
    %c0_103 = arith.constant 0 : index
    %343 = vector.load %arg8[%c0_102, %c0_103] : memref<1x2xf32, #tpu.memory_space<vmem>>, vector<1x2xf32>
    %344 = vector.broadcast %343 : vector<1x2xf32> to vector<8x2xf32>
    %345 = arith.addf %342, %344 : vector<8x2xf32>
    %c0_104 = arith.constant 0 : index
    %c0_105 = arith.constant 0 : index
    %346 = vector.load %arg9[%c0_104, %c0_105] : memref<8x2xf32, #tpu.memory_space<vmem>>, vector<8x2xf32>
    tpu.vector_store %arg9[%c0_104, %c0_105], %345 {strides = array<i32>} : memref<8x2xf32, #tpu.memory_space<vmem>>, vector<8x2xf32>,
    return
  }
  func.func @transform_0(%arg0: i32) -> (i32, i32, i32) {
    %c0_i32 = arith.constant 0 : i32
    %c0_i32_0 = arith.constant 0 : i32
    %c0_i32_1 = arith.constant 0 : i32
    return %c0_i32, %arg0, %c0_i32_0 : i32, i32, i32
  }
  func.func @transform_1(%arg0: i32) -> (i32, i32) {
    %c0_i32 = arith.constant 0 : i32
    %c0_i32_0 = arith.constant 0 : i32
    %c0_i32_1 = arith.constant 0 : i32
    return %c0_i32, %c0_i32_0 : i32, i32
  }
  func.func @transform_2(%arg0: i32) -> (i32, i32) {
    %c0_i32 = arith.constant 0 : i32
    %c0_i32_0 = arith.constant 0 : i32
    %c0_i32_1 = arith.constant 0 : i32
    return %c0_i32, %c0_i32_0 : i32, i32
  }
  func.func @transform_3(%arg0: i32) -> (i32, i32) {
    %c0_i32 = arith.constant 0 : i32
    %c0_i32_0 = arith.constant 0 : i32
    %c0_i32_1 = arith.constant 0 : i32
    return %c0_i32, %c0_i32_0 : i32, i32
  }
  func.func @transform_4(%arg0: i32) -> (i32, i32) {
    %c0_i32 = arith.constant 0 : i32
    %c0_i32_0 = arith.constant 0 : i32
    %c0_i32_1 = arith.constant 0 : i32
    return %c0_i32, %c0_i32_0 : i32, i32
  }
  func.func @transform_5(%arg0: i32) -> (i32, i32) {
    %c0_i32 = arith.constant 0 : i32
    %c0_i32_0 = arith.constant 0 : i32
    %c0_i32_1 = arith.constant 0 : i32
    return %c0_i32, %c0_i32_0 : i32, i32
  }
  func.func @transform_6(%arg0: i32) -> (i32, i32) {
    %c0_i32 = arith.constant 0 : i32
    %c0_i32_0 = arith.constant 0 : i32
    %c0_i32_1 = arith.constant 0 : i32
    return %c0_i32, %c0_i32_0 : i32, i32
  }
  func.func @transform_7(%arg0: i32) -> (i32, i32) {
    %c0_i32 = arith.constant 0 : i32
    %c0_i32_0 = arith.constant 0 : i32
    %c0_i32_1 = arith.constant 0 : i32
    return %c0_i32, %c0_i32_0 : i32, i32
  }
  func.func @transform_8(%arg0: i32) -> (i32, i32) {
    %c0_i32 = arith.constant 0 : i32
    %c0_i32_0 = arith.constant 0 : i32
    return %arg0, %c0_i32 : i32, i32
  }
}

</mosaic_0001>

<bundles_post_ra>
// kernel: tpu_custom_call.1
= control target key start
LH: loop header
LB: loop body
LE: loop exit
PB: predicated region body
PF: predicated region fallthrough
CT: control target
= control target key end

     0   :  { %13 = vsyncpa [#allocation3], 0  ;;  %s2982_s0 = inlined_call_operand.vmem [shape: f32[8,8,57], index: 0, kind: input, shape index: {}]   ;;  %s2983_s1 = inlined_call_operand.hbm [shape: f32[57,512], index: 1, kind: input, shape index: {}]   ;;  %s2984_s2 = inlined_call_operand.vmem [shape: f32[1,512], index: 2, kind: input, shape index: {}]   ;;  %s2985_s3 = inlined_call_operand.hbm [shape: f32[128,512], index: 3, kind: input, shape index: {}]   ;;  %s2986_s4 = inlined_call_operand.vmem [shape: f32[128,5], index: 4, kind: input, shape index: {}]   ;;  %s2987_s5 = inlined_call_operand.vmem [shape: f32[1,5], index: 5, kind: input, shape index: {}]   ;;  %s2988_s6 = inlined_call_operand.vmem [shape: f32[5,2], index: 6, kind: input, shape index: {}]   ;;  %s2989_s7 = inlined_call_operand.vmem [shape: f32[1,2], index: 7, kind: input, shape index: {}]   ;;  %s2990_s8 = inlined_call_operand.vmem [shape: f32[8,2], index: 8, kind: output, shape index: {}]  }
   0x1   :  { %s21_s29 = sshll.u32 %s2983_s1, 4  ;;  %s22_s29 = int_to_ptr.hbm [resolvable:$true] %s21_s29 }
   0x2   :  { %14 = vsyncpa [#allocation5], 0  ;;  %s1613_s30 = smov [#allocation2]   ;;  %s36_s12 = sshll.u32 %s2985_s3, 4  ;;  %s37_s12 = int_to_ptr.hbm [resolvable:$true] %s36_s12 }
   0x3   :  { %s23_s9 = sshll.u32 %s1613_s30, 4  ;;  %s1614_s13 = smov 512   ;;  %s24_s9 = int_to_ptr.vmem [resolvable:$true] %s23_s9 }
   0x4   :  { %s1615_s14 = smov 32   ;;  %s1616_s15 = smov [#allocation4]  }
   0x5   :  { %29 = dma.hbm_to_vmem [thread:$0]  %s22_s29, 4096, %s24_s9, [#allocation3], %s1614_s13, %s1614_s13, %s1615_s14  }
   0x6   :  { %s38_s16 = sshll.u32 %s1616_s15, 4  ;;  %s39_s16 = int_to_ptr.vmem [resolvable:$true] %s38_s16 }
   0x7   :  { %44 = dma.hbm_to_vmem [thread:$0]  %s37_s12, 8192, %s39_s16, [#allocation5], %s1614_s13, %s1614_s13, %s1615_s14  }
   0x8   :  { %1609 = dma.done.wait [#allocation3], 4096  }
   0x9   :  { %1610 = vsyncadd [#allocation3], 4294963200 }
   0xa   :  { %1611 = dma.done.wait [#allocation5], 8192  }
   0xb   :  { %1612 = vsyncadd [#allocation5], 4294959104  ;;  %vm136_vm0 = vcmask 1040384   ;;  %v97_v0 = vld [vmem:[#allocation2 + $0xe0] sm:$0x1]  ;;  %v94_v4 = vld [vmem:[#allocation2 + $0xc8] sm:$0xff] }
   0xc   :  { %v98_v1 = vld [vmem:[#allocation2 + $0xe8] sm:$0x1]  ;;  %v100_v2 = vld [vmem:[#allocation2 + $0xf8] sm:$0x1]  ;;  %1364 = vmatpush.msk.msra.mxu0 %vm136_vm0, %v97_v0  ;;  %1402 = vmatpush.msk.msra.mxu2 %vm136_vm0, %v97_v0  ;;  %v93_v3 = vld [vmem:[#allocation2 + $0xc0] sm:$0xff]  ;;  %vm111_vm1 = vcmask 465920  }
   0xd   :  { %v96_v5 = vld [vmem:[#allocation2 + $0xd8] sm:$0xff]  ;;  %1373 = vmatpush.msk.msra.mxu1 %vm136_vm0, %v98_v1  ;;  %1391 = vmatpush.msk.msra.mxu3 %vm136_vm0, %v100_v2  ;;  %v89_v6 = vld [vmem:[#allocation2 + $0xa0] sm:$0xff]  ;;  %v90_v7 = vld [vmem:[#allocation2 + $0xa8] sm:$0xff]  ;;  %vm1332_vm6 = vcmask 1044480   ;;  %vm1328_vm7 = vcmask 39936   ;;  %vm1356_vm8 = vcmask 15360  }
   0xe   :  { %158 = vmatpush.msra.mxu0 %v93_v3  ;;  %1403 = vmatpush.msra.mxu2 %v93_v3  ;;  %v92_v8 = vld [vmem:[#allocation2 + $0xb8] sm:$0xff]  ;;  %v85_v9 = vld [vmem:[#allocation2 + $0x80] sm:$0xff]  ;;  %v86_v10 = vld [vmem:[#allocation2 + $0x88] sm:$0xff] }
   0xf   :  { %199 = vmatpush.msra.mxu1 %v94_v4  ;;  %281 = vmatpush.msra.mxu3 %v96_v5  ;;  %v88_v11 = vld [vmem:[#allocation2 + $0x98] sm:$0xff]  ;;  %v81_v12 = vld [vmem:[#allocation2 + $0x60] sm:$0xff]  ;;  %v82_v13 = vld [vmem:[#allocation2 + $0x68] sm:$0xff] }
  0x10   :  { %159 = vmatpush.msra.mxu0 %v89_v6  ;;  %1404 = vmatpush.msra.mxu2 %v89_v6  ;;  %v84_v14 = vld [vmem:[#allocation2 + $0x78] sm:$0xff]  ;;  %v77_v15 = vld [vmem:[#allocation2 + $0x40] sm:$0xff]  ;;  %v78_v16 = vld [vmem:[#allocation2 + $0x48] sm:$0xff] }
  0x11   :  { %200 = vmatpush.msra.mxu1 %v90_v7  ;;  %282 = vmatpush.msra.mxu3 %v92_v8  ;;  %v80_v17 = vld [vmem:[#allocation2 + $0x58] sm:$0xff]  ;;  %v73_v18 = vld [vmem:[#allocation2 + $0x20] sm:$0xff]  ;;  %v74_v19 = vld [vmem:[#allocation2 + $0x28] sm:$0xff] }
  0x12   :  { %160 = vmatpush.msra.mxu0 %v85_v9  ;;  %1405 = vmatpush.msra.mxu2 %v85_v9  ;;  %v76_v20 = vld [vmem:[#allocation2 + $0x38] sm:$0xff]  ;;  %v69_v21 = vld [vmem:[#allocation2] sm:$0xff]  ;;  %v70_v22 = vld [vmem:[#allocation2 + $0x8] sm:$0xff] }
  0x13   :  { %201 = vmatpush.msra.mxu1 %v86_v10  ;;  %283 = vmatpush.msra.mxu3 %v88_v11  ;;  %v72_v23 = vld [vmem:[#allocation2 + $0x18] sm:$0xff]  ;;  %v1676_v24 = vld [vmem:[%s2982_s0] sm:$0xff]  ;;  %v1681_v25 = vld [vmem:[%s2982_s0 + $0x30] sm:$0xff] }
  0x14   :  { %161 = vmatpush.msra.mxu0 %v81_v12  ;;  %1406 = vmatpush.msra.mxu2 %v81_v12  ;;  %v99_v26 = vld [vmem:[#allocation2 + $0xf0] sm:$0x1]  ;;  %v1683_v27 = vld [vmem:[#allocation4 + $0x1e8] sm:$0xff]  ;;  %v1689_v29 = vld [vmem:[#allocation4 + $0x1e0] sm:$0xff] }
  0x15   :  { %202 = vmatpush.msra.mxu1 %v82_v13  ;;  %284 = vmatpush.msra.mxu3 %v84_v14  ;;  %v95_v28 = vld [vmem:[#allocation2 + $0xd0] sm:$0xff]  ;;  %3143 = vst [vmem:[#allocation8_spill] sm:$0xff] %v1689_v29  ;;  %v1694_v30 = vld [vmem:[#allocation4 + $0x1c8] sm:$0xff]  ;;  %v1696_v31 = vld [vmem:[#allocation4 + $0x1f8] sm:$0xff] }
  0x16   :  { %162 = vmatpush.msra.mxu0 %v77_v15  ;;  %1407 = vmatpush.msra.mxu2 %v77_v15  ;;  %v91_v32 = vld [vmem:[#allocation2 + $0xb0] sm:$0xff]  ;;  %v1701_v33 = vld [vmem:[#allocation4 + $0x1c0] sm:$0xff]  ;;  %v1704_v34 = vld [vmem:[#allocation4 + $0x1a8] sm:$0xff] }
  0x17   :  { %203 = vmatpush.msra.mxu1 %v78_v16  ;;  %285 = vmatpush.msra.mxu3 %v80_v17  ;;  %v1706_v35 = vld [vmem:[#allocation4 + $0x1d8] sm:$0xff]  ;;  %v87_v36 = vld [vmem:[#allocation2 + $0x90] sm:$0xff]  ;;  %v1709_v37 = vld [vmem:[#allocation4 + $0x1a0] sm:$0xff] }
  0x18   :  { %163 = vmatpush.msra.mxu0 %v73_v18  ;;  %1408 = vmatpush.msra.mxu2 %v73_v18  ;;  %v1715_v38 = vld [vmem:[%s2982_s0 + $0x8] sm:$0xff]  ;;  %v1720_v39 = vld [vmem:[%s2982_s0 + $0x38] sm:$0xff]  ;;  %v83_v40 = vld [vmem:[#allocation2 + $0x70] sm:$0xff] }
  0x19   :  { %204 = vmatpush.msra.mxu1 %v74_v19  ;;  %286 = vmatpush.msra.mxu3 %v76_v20  ;;  %v1726_v41 = vld [vmem:[#allocation4 + $0x180] sm:$0xff]  ;;  %v79_v42 = vld [vmem:[#allocation2 + $0x50] sm:$0xff]  ;;  %v1732_v43 = vld [vmem:[#allocation4 + $0x188] sm:$0xff] }
  0x1a   :  { %164 = vmatpush.msra.mxu0 %v69_v21  ;;  %1409 = vmatpush.msra.mxu2 %v69_v21  ;;  %v1736_v44 = vld [vmem:[#allocation4 + $0x160] sm:$0xff]  ;;  %v1738_v45 = vld [vmem:[#allocation4 + $0x1b8] sm:$0xff]  ;;  %v75_v46 = vld [vmem:[#allocation2 + $0x30] sm:$0xff] }
  0x1b   :  { %205 = vmatpush.msra.mxu1 %v70_v22  ;;  %287 = vmatpush.msra.mxu3 %v72_v23  ;;  %v1743_v47 = vld [vmem:[#allocation4 + $0x168] sm:$0xff]  ;;  %v1745_v48 = vld [vmem:[#allocation4 + $0x140] sm:$0xff]  ;;  %v1748_v49 = vld [vmem:[#allocation4 + $0x198] sm:$0xff] }
  0x1c   :  { %1365 = vmatmul.msk.f32.vlgmr.msra.gmra.mxu0 %vm111_vm1, %v1676_v24  ;;  %1371 = vmatmul.msk.f32.vlgmr.msra.gmra.mxu2 %vm111_vm1, %v1681_v25  ;;  %v71_v50 = vld [vmem:[#allocation2 + $0x10] sm:$0xff]  ;;  %v1752_v51 = vld [vmem:[#allocation4 + $0x148] sm:$0xff]  ;;  %v1764_v54 = vld [vmem:[#allocation4 + $0x120] sm:$0xff] }
  0x1d   :  { %1374 = vmatmul.msk.f32.vlgmr.msra.gmra.mxu1 %vm111_vm1, %v1676_v24  ;;  %1382 = vmatpush.msk.msrb.mxu2 %vm136_vm0, %v99_v26  ;;  %v1757_v52 = vld [vmem:[%s2982_s0 + $0x10] sm:$0xff]  ;;  %v1773_v56 = vld [vmem:[#allocation4 + $0x178] sm:$0xff]  ;;  %v1778_v57 = vld [vmem:[#allocation4 + $0x100] sm:$0xff] }
  0x1e   :  { %1392 = vmatmul.msk.f32.vlgmr.msra.gmra.mxu3 %vm111_vm1, %v1676_v24  ;;  %458 = vmatpush.msrb.mxu1 %v1683_v27  ;;  %v1760_v53 = vld [vmem:[#allocation4 + $0x1f0] sm:$0xff]  ;;  %v1780_v58 = vld [vmem:[#allocation4 + $0x128] sm:$0xff]  ;;  %v1787_v60 = vld [vmem:[#allocation4 + $0x158] sm:$0xff] }
  0x1f   :  { %240 = vmatpush.msrb.mxu2 %v95_v28  ;;  %438 = vmatpush.msrb.mxu0 %v1689_v29  ;;  %v1771_v55 = vld [vmem:[#allocation4 + $0x1d0] sm:$0xff]  ;;  %v1790_v61 = vld [vmem:[#allocation4 + $0xe0] sm:$0xff]  ;;  %v1793_v62 = vld [vmem:[#allocation4 + $0x108] sm:$0xff] }
  0x20   :  { %459 = vmatpush.msrb.mxu1 %v1694_v30  ;;  %498 = vmatpush.msrb.mxu3 %v1696_v31  ;;  %v1784_v59 = vld [vmem:[#allocation4 + $0x1b0] sm:$0xff]  ;;  %3144 = vst [vmem:[#allocation9_spill] sm:$0xff] %v1790_v61  ;;  %v1799_v0 = vld [vmem:[#allocation4 + $0x138] sm:$0xff]  ;;  %v1813_v3 = vld [vmem:[#allocation4 + $0xc0] sm:$0xff] }
  0x21   :  { %241 = vmatpush.msrb.mxu2 %v91_v32  ;;  %439 = vmatpush.msrb.mxu0 %v1701_v33  ;;  %v1795_v63 = vld [vmem:[#allocation4 + $0x190] sm:$0xff]  ;;  %v1804_v1 = vld [vmem:[%s2982_s0 + $0x18] sm:$0xff]  ;;  %3145 = vst [vmem:[#allocation10_spill] sm:$0xff] %v1813_v3  ;;  %v1827_v6 = vld [vmem:[#allocation4 + $0xa0] sm:$0xff] }
  0x22   :  { %460 = vmatpush.msrb.mxu1 %v1704_v34  ;;  %499 = vmatpush.msrb.mxu3 %v1706_v35  ;;  %v1808_v2 = vld [vmem:[#allocation4 + $0x170] sm:$0xff]  ;;  %v1822_v5 = vld [vmem:[#allocation4 + $0x118] sm:$0xff]  ;;  %3146 = vst [vmem:[#allocation11_spill] sm:$0xff] %v1827_v6  ;;  %v1829_v7 = vld [vmem:[#allocation4 + $0xe8] sm:$0xff] }
  0x23   :  { %242 = vmatpush.msrb.mxu2 %v87_v36  ;;  %440 = vmatpush.msrb.mxu0 %v1709_v37  ;;  %v1820_v4 = vld [vmem:[#allocation4 + $0x150] sm:$0xff]  ;;  %3147 = vst [vmem:[#allocation12_spill] sm:$0xff] %v1829_v7  ;;  %v1836_v9 = vld [vmem:[#allocation4 + $0xf8] sm:$0xff]  ;;  %v1839_v10 = vld [vmem:[#allocation4 + $0x80] sm:$0xff] }
  0x24   :  { %1366 = vmatmul.msk.f32.gmra.mxu0 %vm111_vm1, %v1715_v38  ;;  %1372 = vmatmul.msk.f32.gmra.mxu2 %vm111_vm1, %v1720_v39  ;;  %v1834_v8 = vld [vmem:[#allocation4 + $0x130] sm:$0xff]  ;;  %3148 = vst [vmem:[#allocation13_spill] sm:$0xff] %v1836_v9  ;;  %v1842_v11 = vld [vmem:[#allocation4 + $0xc8] sm:$0xff]  ;;  %v1848_v13 = vld [vmem:[#allocation4 + $0xd8] sm:$0xff] }
  0x25   :  { %1375 = vmatmul.msk.f32.gmra.mxu1 %vm111_vm1, %v1715_v38  ;;  %243 = vmatpush.msrb.mxu2 %v83_v40  ;;  %3149 = vst [vmem:[#allocation14_spill] sm:$0xff] %v1839_v10  ;;  %v1845_v12 = vld [vmem:[#allocation4 + $0x110] sm:$0xff]  ;;  %v1853_v14 = vld [vmem:[%s2982_s0 + $0x20] sm:$0xff]  ;;  %v1871_v18 = vld [vmem:[#allocation4 + $0xa8] sm:$0xff] }
  0x26   :  { %1393 = vmatmul.msk.f32.gmra.mxu3 %vm111_vm1, %v1715_v38  ;;  %441 = vmatpush.msrb.mxu0 %v1726_v41  ;;  %3150 = vst [vmem:[#allocation15_spill] sm:$0xff] %v1842_v11  ;;  %v1858_v15 = vld [vmem:[#allocation4 + $0x60] sm:$0xff]  ;;  %v1862_v16 = vld [vmem:[#allocation4 + $0xf0] sm:$0xff]  ;;  %v1878_v20 = vld [vmem:[#allocation4 + $0xb8] sm:$0xff] }
  0x27   :  { %244 = vmatpush.msrb.mxu2 %v79_v42  ;;  %461 = vmatpush.msrb.mxu1 %v1732_v43  ;;  %3151 = vst [vmem:[#allocation16_spill] sm:$0xff] %v1848_v13  ;;  %v1869_v17 = vld [vmem:[#allocation4 + $0x40] sm:$0xff]  ;;  %v1876_v19 = vld [vmem:[#allocation4 + $0xd0] sm:$0xff]  ;;  %v1885_v22 = vld [vmem:[#allocation4 + $0x88] sm:$0xff] }
  0x28   :  { %442 = vmatpush.msrb.mxu0 %v1736_v44  ;;  %500 = vmatpush.msrb.mxu3 %v1738_v45  ;;  %3152 = vst [vmem:[#allocation17_spill] sm:$0xff] %v1858_v15  ;;  %v1882_v21 = vld [vmem:[#allocation4 + $0x20] sm:$0xff]  ;;  %v1889_v23 = vld [vmem:[#allocation4 + $0x98] sm:$0xff]  ;;  %v1897_v28 = vld [vmem:[#allocation4 + $0x68] sm:$0xff] }
  0x29   :  { %245 = vmatpush.msrb.mxu2 %v75_v46  ;;  %462 = vmatpush.msrb.mxu1 %v1743_v47  ;;  %3153 = vst [vmem:[#allocation18_spill] sm:$0xff] %v1862_v16  ;;  %v1893_v26 = vld [vmem:[#allocation4] sm:$0xff]  ;;  %v66_v32 = vld [vmem:[%s2982_s0 + $0x28] sm:$0xff]  ;;  %v1906_v36 = vld [vmem:[#allocation4 + $0x78] sm:$0xff] }
  0x2a   :  { %443 = vmatpush.msrb.mxu0 %v1745_v48  ;;  %501 = vmatpush.msrb.mxu3 %v1748_v49  ;;  %3154 = vst [vmem:[#allocation19_spill] sm:$0xff] %v1869_v17  ;;  %v1915_v40 = vld [vmem:[#allocation4 + $0x58] sm:$0xff]  ;;  %v1917_v42 = vld [vmem:[#allocation4 + $0x90] sm:$0xff]  ;;  %v1921_v46 = vld [vmem:[#allocation4 + $0x28] sm:$0xff] }
  0x2b   :  { %246 = vmatpush.msrb.mxu2 %v71_v50  ;;  %463 = vmatpush.msrb.mxu1 %v1752_v51  ;;  %3155 = vst [vmem:[#allocation20_spill] sm:$0xff] %v1871_v18  ;;  %v1925_v50 = vld [vmem:[#allocation4 + $0x38] sm:$0xff] }
  0x2c   :  { %1367 = vmatmul.msk.f32.gmra.mxu0 %vm111_vm1, %v1757_v52  ;;  %1383 = vmatmul.msk.f32.vlgmr.msrb.gmra.mxu2 %vm111_vm1, %v1676_v24  ;;  %3156 = vst [vmem:[#allocation21_spill] sm:$0xff] %v1876_v19  ;;  %v1891_v24 = vld [vmem:[#allocation4 + $0xb0] sm:$0xff] }
  0x2d   :  { %1376 = vmatmul.msk.f32.gmra.mxu1 %vm111_vm1, %v1757_v52  ;;  %478 = vmatpush.msra.mxu2 %v1760_v53  ;;  %3157 = vst [vmem:[#allocation22_spill] sm:$0xff] %v1878_v20 }
  0x2e   :  { %1394 = vmatmul.msk.f32.gmra.mxu3 %vm111_vm1, %v1757_v52  ;;  %444 = vmatpush.msrb.mxu0 %v1764_v54  ;;  %3158 = vst [vmem:[#allocation23_spill] sm:$0xff] %v1882_v21 }
  0x2f   :  { %479 = vmatpush.msra.mxu2 %v1771_v55  ;;  %502 = vmatpush.msrb.mxu3 %v1773_v56  ;;  %3159 = vst [vmem:[#allocation24_spill] sm:$0xff] %v1885_v22 }
  0x30   :  { %445 = vmatpush.msrb.mxu0 %v1778_v57  ;;  %464 = vmatpush.msrb.mxu1 %v1780_v58  ;;  %3160 = vst [vmem:[#allocation25_spill] sm:$0xff] %v1889_v23 }
  0x31   :  { %480 = vmatpush.msra.mxu2 %v1784_v59  ;;  %503 = vmatpush.msrb.mxu3 %v1787_v60  ;;  %3161 = vst [vmem:[#allocation26_spill] sm:$0xff] %v1891_v24 }
  0x32   :  { %446 = vmatpush.msrb.mxu0 %v1790_v61  ;;  %465 = vmatpush.msrb.mxu1 %v1793_v62  ;;  %3162 = vst [vmem:[#allocation27_spill] sm:$0xff] %v1893_v26 }
  0x33   :  { %481 = vmatpush.msra.mxu2 %v1795_v63  ;;  %504 = vmatpush.msrb.mxu3 %v1799_v0  ;;  %3163 = vst [vmem:[#allocation28_spill] sm:$0xff] %v1897_v28 }
  0x34   :  { %1368 = vmatmul.msk.f32.gmra.mxu0 %vm111_vm1, %v1804_v1  ;;  %1384 = vmatmul.msk.f32.gmra.mxu2 %vm111_vm1, %v1715_v38  ;;  %3164 = vst [vmem:[#allocation29_spill] sm:$0xff] %v1906_v36  ;;  %v1910_v38 = vld [vmem:[#allocation4 + $0x48] sm:$0xff] }
  0x35   :  { %1377 = vmatmul.msk.f32.gmra.mxu1 %vm111_vm1, %v1804_v1  ;;  %482 = vmatpush.msra.mxu2 %v1808_v2  ;;  %3165 = vst [vmem:[#allocation30_spill] sm:$0xff] %v1910_v38 }
  0x36   :  { %1395 = vmatmul.msk.f32.gmra.mxu3 %vm111_vm1, %v1804_v1  ;;  %447 = vmatpush.msrb.mxu0 %v1813_v3  ;;  %3166 = vst [vmem:[#allocation31_spill] sm:$0xff] %v1915_v40 }
  0x37   :  { %483 = vmatpush.msra.mxu2 %v1820_v4  ;;  %505 = vmatpush.msrb.mxu3 %v1822_v5  ;;  %3167 = vst [vmem:[#allocation32_spill] sm:$0xff] %v1917_v42 }
  0x38   :  { %448 = vmatpush.msrb.mxu0 %v1827_v6  ;;  %466 = vmatpush.msrb.mxu1 %v1829_v7  ;;  %3168 = vst [vmem:[#allocation33_spill] sm:$0xff] %v1921_v46 }
  0x39   :  { %484 = vmatpush.msra.mxu2 %v1834_v8  ;;  %506 = vmatpush.msrb.mxu3 %v1836_v9  ;;  %3169 = vst [vmem:[#allocation34_spill] sm:$0xff] %v1925_v50 }
  0x3a   :  { %449 = vmatpush.msrb.mxu0 %v1839_v10  ;;  %467 = vmatpush.msrb.mxu1 %v1842_v11 }
  0x3b   :  { %485 = vmatpush.msra.mxu2 %v1845_v12  ;;  %507 = vmatpush.msrb.mxu3 %v1848_v13 }
  0x3c   :  { %1369 = vmatmul.msk.f32.gmra.mxu0 %vm111_vm1, %v1853_v14  ;;  %1385 = vmatmul.msk.f32.gmra.mxu2 %vm111_vm1, %v1757_v52  ;;  %v1927_v52 = vld [vmem:[#allocation4 + $0x70] sm:$0xff] }
  0x3d   :  { %1378 = vmatmul.msk.f32.gmra.mxu1 %vm111_vm1, %v1853_v14  ;;  %450 = vmatpush.msrb.mxu0 %v1858_v15  ;;  %3170 = vst [vmem:[#allocation35_spill] sm:$0xff] %v1927_v52 }
  0x3e   :  { %1396 = vmatmul.msk.f32.gmra.mxu3 %vm111_vm1, %v1853_v14  ;;  %486 = vmatpush.msra.mxu2 %v1862_v16 }
  0x3f   :  { %451 = vmatpush.msrb.mxu0 %v1869_v17  ;;  %468 = vmatpush.msrb.mxu1 %v1871_v18 }
  0x40   :  { %487 = vmatpush.msra.mxu2 %v1876_v19  ;;  %508 = vmatpush.msrb.mxu3 %v1878_v20 }
  0x41   :  { %452 = vmatpush.msrb.mxu0 %v1882_v21  ;;  %469 = vmatpush.msrb.mxu1 %v1885_v22  ;;  %v1936_v21 = vld [vmem:[#allocation4 + $0x50] sm:$0xff] }
  0x42   :  { %509 = vmatpush.msrb.mxu3 %v1889_v23  ;;  %488 = vmatpush.msra.mxu2 %v1891_v24  ;;  %3173 = vst [vmem:[#allocation38_spill] sm:$0xff] %v1936_v21 }
  0x43   :  { %453 = vmatpush.msrb.mxu0 %v1893_v26  ;;  %470 = vmatpush.msrb.mxu1 %v1897_v28  ;;  %v1934_v26 = vld [vmem:[#allocation4 + $0x18] sm:$0xff] }
  0x44   :  { %1370 = vmatmul.msk.f32.gmra.mxu0 %vm111_vm1, %v66_v32  ;;  %1386 = vmatmul.msk.f32.gmra.mxu2 %vm111_vm1, %v1804_v1  ;;  %v1931_v1 = vld [vmem:[#allocation4 + $0x8] sm:$0xff]  ;;  %3172 = vst [vmem:[#allocation37_spill] sm:$0xff] %v1934_v26 }
  0x45   :  { %1379 = vmatmul.msk.f32.gmra.mxu1 %vm111_vm1, %v66_v32  ;;  %510 = vmatpush.msrb.mxu3 %v1906_v36  ;;  %3171 = vst [vmem:[#allocation36_spill] sm:$0xff] %v1931_v1 }
  0x46   :  { %1397 = vmatmul.msk.f32.gmra.mxu3 %vm111_vm1, %v66_v32  ;;  %471 = vmatpush.msrb.mxu1 %v1910_v38  ;;  %v1942_v38 = vld [vmem:[#allocation4 + $0x30] sm:$0xff] }
  0x47   :  { %511 = vmatpush.msrb.mxu3 %v1915_v40  ;;  %489 = vmatpush.msra.mxu2 %v1917_v42  ;;  %3174 = vst [vmem:[#allocation39_spill] sm:$0xff] %v1942_v38 }
  0x48   :  { %472 = vmatpush.msrb.mxu1 %v1921_v46  ;;  %544 = vmatpush.msra.mxu0 %v1689_v29  ;;  %v1617_v46 = vmov 0.0   ;;  %v1950_v29 = vld [vmem:[#allocation4 + $0x10] sm:$0xff] }
  0x49   :  { %512 = vmatpush.msrb.mxu3 %v1925_v50  ;;  %490 = vmatpush.msra.mxu2 %v1927_v52  ;;  %3175 = vst [vmem:[#allocation40_spill] sm:$0xff] %v1950_v29 }
  0x4a   :  { %473 = vmatpush.msrb.mxu1 %v1931_v1  ;;  %545 = vmatpush.msra.mxu0 %v1701_v33 }
  0x4b   :  { %513 = vmatpush.msrb.mxu3 %v1934_v26  ;;  %491 = vmatpush.msra.mxu2 %v1936_v21 }
  0x4c   :  { %1387 = vmatmul.msk.f32.gmra.mxu2 %vm111_vm1, %v1853_v14  ;;  %454 = vmatmul.f32.vlgmr.msrb.gmra.mxu0 %v1617_v46  ;;  %v3178_v14 = vld [vmem:[#allocation33_spill] sm:$0xff] }
  0x4d   :  { %1380 = vmatmul.msk.f32.gmra.mxu1 %vm111_vm1, %v1681_v25  ;;  %492 = vmatpush.msra.mxu2 %v1942_v38 }
  0x4e   :  { %1398 = vmatmul.msk.f32.gmra.mxu3 %vm111_vm1, %v1681_v25  ;;  %564 = vmatpush.msra.mxu1 %v1683_v27 }
  0x4f   :  { %493 = vmatpush.msra.mxu2 %v1950_v29  ;;  %604 = vmatpush.msra.mxu3 %v1696_v31 }
  0x50   :  { %565 = vmatpush.msra.mxu1 %v1694_v30  ;;  %546 = vmatpush.msra.mxu0 %v1709_v37 }
  0x51   :  { %584 = vmatpush.msrb.mxu2 %v1760_v53  ;;  %605 = vmatpush.msra.mxu3 %v1706_v35 }
  0x52   :  { %566 = vmatpush.msra.mxu1 %v1704_v34  ;;  %547 = vmatpush.msra.mxu0 %v1726_v41 }
  0x53   :  { %585 = vmatpush.msrb.mxu2 %v1771_v55  ;;  %606 = vmatpush.msra.mxu3 %v1738_v45 }
  0x54   :  { %1388 = vmatmul.msk.f32.gmra.mxu2 %vm111_vm1, %v66_v32  ;;  %567 = vmatpush.msra.mxu1 %v1732_v43  ;;  %v3179_v32 = vld [vmem:[#allocation27_spill] sm:$0xff] }
  0x55   :  { %1381 = vmatmul.msk.f32.gmra.mxu1 %vm111_vm1, %v1720_v39  ;;  %586 = vmatpush.msrb.mxu2 %v1784_v59 }
  0x56   :  { %1399 = vmatmul.msk.f32.gmra.mxu3 %vm111_vm1, %v1720_v39  ;;  %548 = vmatpush.msra.mxu0 %v1736_v44 }
  0x57   :  { %587 = vmatpush.msrb.mxu2 %v1795_v63  ;;  %607 = vmatpush.msra.mxu3 %v1748_v49 }
  0x58   :  { %568 = vmatpush.msra.mxu1 %v1743_v47  ;;  %549 = vmatpush.msra.mxu0 %v1745_v48 }
  0x59   :  { %588 = vmatpush.msrb.mxu2 %v1808_v2  ;;  %608 = vmatpush.msra.mxu3 %v1773_v56 }
  0x5a   :  { %569 = vmatpush.msra.mxu1 %v1752_v51  ;;  %550 = vmatpush.msra.mxu0 %v1764_v54 }
  0x5b   :  { %589 = vmatpush.msrb.mxu2 %v1820_v4  ;;  %609 = vmatpush.msra.mxu3 %v1787_v60 }
  0x5c   :  { %1389 = vmatmul.msk.f32.gmra.mxu2 %vm111_vm1, %v1681_v25  ;;  %570 = vmatpush.msra.mxu1 %v1780_v58  ;;  %v3176_v25 = vld [vmem:[#allocation30_spill] sm:$0xff] }
  0x5d   :  { %474 = vmatmul.f32.vlgmr.msrb.gmra.mxu1 %v1617_v46  ;;  %590 = vmatpush.msrb.mxu2 %v1834_v8 }
  0x5e   :  { %514 = vmatmul.f32.vlgmr.msrb.gmra.mxu3 %v1617_v46  ;;  %551 = vmatpush.msra.mxu0 %v1778_v57 }
  0x5f   :  { %610 = vmatpush.msra.mxu3 %v1799_v0  ;;  %571 = vmatpush.msra.mxu1 %v1793_v62 }
  0x60   :  { %591 = vmatpush.msrb.mxu2 %v1845_v12  ;;  %552 = vmatpush.msra.mxu0 %v1790_v61 }
  0x61   :  { %611 = vmatpush.msra.mxu3 %v1822_v5  ;;  %572 = vmatpush.msra.mxu1 %v1829_v7 }
  0x62   :  { %592 = vmatpush.msrb.mxu2 %v1862_v16  ;;  %553 = vmatpush.msra.mxu0 %v1813_v3 }
  0x63   :  { %612 = vmatpush.msra.mxu3 %v1836_v9  ;;  %573 = vmatpush.msra.mxu1 %v1842_v11 }
  0x64   :  { %1390 = vmatmul.msk.f32.gmra.mxu2 %vm111_vm1, %v1720_v39  ;;  %554 = vmatpush.msra.mxu0 %v1827_v6  ;;  %v3177_v39 = vld [vmem:[#allocation23_spill] sm:$0xff] }
  0x65   :  { %593 = vmatpush.msrb.mxu2 %v1876_v19  ;;  %613 = vmatpush.msra.mxu3 %v1848_v13 }
  0x66   :  { %574 = vmatpush.msra.mxu1 %v1871_v18  ;;  %555 = vmatpush.msra.mxu0 %v1839_v10 }
  0x67   :  { %594 = vmatpush.msrb.mxu2 %v1891_v24  ;;  %614 = vmatpush.msra.mxu3 %v1878_v20 }
  0x68   :  { %575 = vmatpush.msra.mxu1 %v1885_v22  ;;  %556 = vmatpush.msra.mxu0 %v1858_v15 }
  0x69   :  { %595 = vmatpush.msrb.mxu2 %v1917_v42  ;;  %615 = vmatpush.msra.mxu3 %v1889_v23 }
  0x6a   :  { %576 = vmatpush.msra.mxu1 %v1897_v28  ;;  %557 = vmatpush.msra.mxu0 %v1869_v17 }
  0x6b   :  { %596 = vmatpush.msrb.mxu2 %v1927_v52  ;;  %616 = vmatpush.msra.mxu3 %v1906_v36 }
  0x6c   :  { %494 = vmatmul.f32.vlgmr.msra.gmra.mxu2 %v1617_v46  ;;  %577 = vmatpush.msra.mxu1 %v3176_v25  ;;  %v3180_v46 = vld [vmem:[#allocation8_spill] sm:$0xff] }
  0x6d   :  { %597 = vmatpush.msrb.mxu2 %v1936_v21  ;;  %617 = vmatpush.msra.mxu3 %v1915_v40 }
  0x6e   :  { %558 = vmatpush.msra.mxu0 %v3177_v39  ;;  %578 = vmatpush.msra.mxu1 %v3178_v14 }
  0x6f   :  { %598 = vmatpush.msrb.mxu2 %v1942_v38  ;;  %618 = vmatpush.msra.mxu3 %v1925_v50 }
  0x70   :  { %559 = vmatpush.msra.mxu0 %v3179_v32  ;;  %579 = vmatpush.msra.mxu1 %v1931_v1 }
  0x71   :  { %599 = vmatpush.msrb.mxu2 %v1950_v29  ;;  %619 = vmatpush.msra.mxu3 %v1934_v26 }
  0x72   :  { %650 = vmatpush.msrb.mxu0 %v3180_v46  ;;  %670 = vmatpush.msrb.mxu1 %v1683_v27 }
  0x73   :  { %690 = vmatpush.msra.mxu2 %v1760_v53  ;;  %710 = vmatpush.msrb.mxu3 %v1696_v31 }
  0x74   :  { %651 = vmatpush.msrb.mxu0 %v1701_v33  ;;  %671 = vmatpush.msrb.mxu1 %v1694_v30 }
  0x75   :  { %691 = vmatpush.msra.mxu2 %v1771_v55  ;;  %711 = vmatpush.msrb.mxu3 %v1706_v35 }
  0x76   :  { %652 = vmatpush.msrb.mxu0 %v1709_v37  ;;  %672 = vmatpush.msrb.mxu1 %v1704_v34 }
  0x77   :  { %692 = vmatpush.msra.mxu2 %v1784_v59  ;;  %712 = vmatpush.msrb.mxu3 %v1738_v45 }
  0x78   :  { %653 = vmatpush.msrb.mxu0 %v1726_v41  ;;  %673 = vmatpush.msrb.mxu1 %v1732_v43 }
  0x79   :  { %693 = vmatpush.msra.mxu2 %v1795_v63  ;;  %713 = vmatpush.msrb.mxu3 %v1748_v49 }
  0x7a   :  { %654 = vmatpush.msrb.mxu0 %v1736_v44  ;;  %674 = vmatpush.msrb.mxu1 %v1743_v47 }
  0x7b   :  { %694 = vmatpush.msra.mxu2 %v1808_v2  ;;  %714 = vmatpush.msrb.mxu3 %v1773_v56 }
  0x7c   :  { %655 = vmatpush.msrb.mxu0 %v1745_v48  ;;  %675 = vmatpush.msrb.mxu1 %v1752_v51 }
  0x7d   :  { %695 = vmatpush.msra.mxu2 %v1820_v4  ;;  %715 = vmatpush.msrb.mxu3 %v1787_v60 }
  0x7e   :  { %656 = vmatpush.msrb.mxu0 %v1764_v54  ;;  %676 = vmatpush.msrb.mxu1 %v1780_v58 }
  0x7f   :  { %696 = vmatpush.msra.mxu2 %v1834_v8  ;;  %716 = vmatpush.msrb.mxu3 %v1799_v0 }
  0x80   :  { %657 = vmatpush.msrb.mxu0 %v1778_v57  ;;  %677 = vmatpush.msrb.mxu1 %v1793_v62 }
  0x81   :  { %697 = vmatpush.msra.mxu2 %v1845_v12  ;;  %717 = vmatpush.msrb.mxu3 %v1822_v5 }
  0x82   :  { %658 = vmatpush.msrb.mxu0 %v1790_v61  ;;  %678 = vmatpush.msrb.mxu1 %v1829_v7 }
  0x83   :  { %698 = vmatpush.msra.mxu2 %v1862_v16  ;;  %718 = vmatpush.msrb.mxu3 %v1836_v9  ;;  %v3191_v9 = vmov 0 }
  0x84   :  { %659 = vmatpush.msrb.mxu0 %v1813_v3  ;;  %679 = vmatpush.msrb.mxu1 %v1842_v11 }
  0x85   :  { %699 = vmatpush.msra.mxu2 %v1876_v19  ;;  %719 = vmatpush.msrb.mxu3 %v1848_v13 }
  0x86   :  { %660 = vmatpush.msrb.mxu0 %v1827_v6  ;;  %680 = vmatpush.msrb.mxu1 %v1871_v18 }
  0x87   :  { %700 = vmatpush.msra.mxu2 %v1891_v24  ;;  %720 = vmatpush.msrb.mxu3 %v1878_v20 }
  0x88   :  { %661 = vmatpush.msrb.mxu0 %v1839_v10  ;;  %681 = vmatpush.msrb.mxu1 %v1885_v22 }
  0x89   :  { %701 = vmatpush.msra.mxu2 %v1917_v42  ;;  %721 = vmatpush.msrb.mxu3 %v1889_v23 }
  0x8a   :  { %662 = vmatpush.msrb.mxu0 %v1858_v15  ;;  %682 = vmatpush.msrb.mxu1 %v1897_v28 }
  0x8b   :  { %702 = vmatpush.msra.mxu2 %v1927_v52  ;;  %722 = vmatpush.msrb.mxu3 %v1906_v36 }
  0x8c   :  { %663 = vmatpush.msrb.mxu0 %v1869_v17  ;;  %683 = vmatpush.msrb.mxu1 %v3176_v25 }
  0x8d   :  { %703 = vmatpush.msra.mxu2 %v1936_v21  ;;  %723 = vmatpush.msrb.mxu3 %v1915_v40  ;;  %v101_v40 = vld [vmem:[%s2984_s2] sm:$0xf] }
  0x8e   :  { %664 = vmatpush.msrb.mxu0 %v3177_v39  ;;  %684 = vmatpush.msrb.mxu1 %v3178_v14  ;;  %v377_v39 = vlaneseq  ;;  %v103_v14 = vperm.slane %v101_v40, 0  ;;  %v2121_v23 = vperm.slane %v101_v40, 3  ;;  %v2146_v6 = vperm.slane %v101_v40, 2 }
  0x8f   :  { %704 = vmatpush.msra.mxu2 %v1942_v38  ;;  %724 = vmatpush.msrb.mxu3 %v1925_v50 }
  0x90   :  { %665 = vmatpush.msrb.mxu0 %v3179_v32  ;;  %685 = vmatpush.msrb.mxu1 %v1931_v1  ;;  %v2101_v38 = vand.u32 127, %v377_v39  ;;  %v2103_v32 = vperm.slane %v101_v40, 1 }
  0x91   :  { %705 = vmatpush.msra.mxu2 %v1950_v29  ;;  %725 = vmatpush.msrb.mxu3 %v1934_v26 }
  0x92   :  { %vm430_vm2 = vcmp.lt.s32.totalorder %v2101_v38, 64  ;;  %v381_v40 = vadd.s32 384, %v2101_v38 }
  0x99   :  { %v166_v21 = vpop.f32.mrf.mxu0 }
  0x9a   :  { %v2099_v25 = vpop.f32.mrf.mxu1 }
  0x9f   :  { %v184_v50 = vpop.f32.mrf.mxu2 }
  0xa0   :  { %v185_v17 = vadd.f32 %v184_v50, %v103_v14  ;;  %v2119_v50 = vadd.f32 %v166_v21, %v103_v14 }
  0xa1   :  { %v2105_v1 = vpop.f32.mrf.mxu3  ;;  %v169_v29 = vpop.f32.mrf.mxu0 }
  0xa2   :  { %v170_v26 = vadd.f32 %v169_v29, %v103_v14  ;;  %v210_v36 = vpop.f32.mrf.mxu1 }
  0xa3   :  { %v2109_v52 = vadd.f32 %v210_v36, %v2103_v32 }
  0xa4   :  { %v2113_v28 = vsel %vm430_vm2, %v170_v26, %v185_v17  ;;  %v2117_v39 = vsel %vm430_vm2, %v185_v17, %v170_v26 }
  0xa5   :  { %3181 = vst [vmem:[#allocation8_spill] sm:$0xff] %v2109_v52 }
  0xa6   :  { %3182 = vst [vmem:[#allocation41_spill] sm:$0xff] %v2113_v28 }
  0xa7   :  { %3183 = vst [vmem:[#allocation42_spill] sm:$0xff] %v2117_v39  ;;  %v187_v15 = vpop.f32.mrf.mxu2 }
  0xa8   :  { %v2123_v42 = vadd.f32 %v187_v15, %v103_v14 }
  0xa9   :  { %v292_v29 = vpop.f32.mrf.mxu3  ;;  %v172_v22 = vpop.f32.mrf.mxu0 }
  0xaa   :  { %v2126_v36 = vadd.f32 %v292_v29, %v2121_v23  ;;  %v173_v10 = vadd.f32 %v172_v22, %v103_v14  ;;  %v213_v20 = vpop.f32.mrf.mxu1  ;;  %v2132_v17 = vsel %vm430_vm2, %v2123_v42, %v2119_v50  ;;  %v379_v22 = vadd.s32 128, %v2101_v38 }
  0xab   :  { %3185 = vst [vmem:[#allocation44_spill] sm:$0xff] %v2132_v17  ;;  %v2135_v21 = vadd.f32 %v213_v20, %v2103_v32 }
  0xac   :  { %3184 = vst [vmem:[#allocation43_spill] sm:$0xff] %v2126_v36  ;;  %v393_v17 = vand.u32 127, %v379_v22 }
  0xad   :  { %3186 = vst [vmem:[#allocation45_spill] sm:$0xff] %v2135_v21 }
  0xae   :  { %vm2154_vm3 = vcmp.lt.s32.totalorder %v393_v17, 64 }
  0xaf   :  { %v2137_v26 = vpop.f32.mrf.mxu2  ;;  %v3192_v9 = vsel %vm2154_vm3, 4294967295, %v3191_v9 }
  0xb0   :  { %3193 = vst [vmem:[#allocation50_spill] sm:$0xff] %v3192_v9 }
  0xb1   :  { %v295_v15 = vpop.f32.mrf.mxu3  ;;  %v175_v39 = vpop.f32.mrf.mxu0 }
  0xb2   :  { %v2140_v28 = vadd.f32 %v295_v15, %v2121_v23  ;;  %v176_v29 = vadd.f32 %v175_v39, %v103_v14  ;;  %v216_v24 = vpop.f32.mrf.mxu1 }
  0xb3   :  { %v2144_v18 = vadd.f32 %v216_v24, %v2103_v32 }
  0xb4   :  { %3187 = vst [vmem:[#allocation46_spill] sm:$0xff] %v2140_v28 }
  0xb5   :  { %3188 = vst [vmem:[#allocation47_spill] sm:$0xff] %v2144_v18 }
  0xb7   :  { %v251_v13 = vpop.f32.mrf.mxu2 }
  0xb8   :  { %v2149_v20 = vadd.f32 %v251_v13, %v2146_v6 }
  0xb9   :  { %v298_v19 = vpop.f32.mrf.mxu3  ;;  %v178_v11 = vpop.f32.mrf.mxu0 }
  0xba   :  { %3189 = vst [vmem:[#allocation48_spill] sm:$0xff] %v2149_v20  ;;  %v2152_v3 = vadd.f32 %v298_v19, %v2121_v23  ;;  %v179_v15 = vadd.f32 %v178_v11, %v103_v14  ;;  %v219_v39 = vpop.f32.mrf.mxu1  ;;  %v380_v19 = vadd.s32 256, %v2101_v38 }
  0xbb   :  { %v2159_v24 = vadd.f32 %v219_v39, %v2103_v32  ;;  %v407_v39 = vand.u32 127, %v381_v40 }
  0xbc   :  { %3190 = vst [vmem:[#allocation49_spill] sm:$0xff] %v2152_v3  ;;  %v2164_v13 = vsel %vm430_vm2, %v176_v29, %v179_v15  ;;  %v2168_v22 = vsel %vm430_vm2, %v179_v15, %v176_v29 }
  0xbd   :  { %3194 = vst [vmem:[#allocation51_spill] sm:$0xff] %v2159_v24  ;;  %vm2187_vm4 = vcmp.lt.s32.totalorder %v407_v39, 64 }
  0xbe   :  { %3195 = vst [vmem:[#allocation52_spill] sm:$0xff] %v2164_v13 }
  0xbf   :  { %3196 = vst [vmem:[#allocation53_spill] sm:$0xff] %v2168_v22  ;;  %v254_v17 = vpop.f32.mrf.mxu2 }
  0xc0   :  { %v2179_v16 = vadd.f32 %v254_v17, %v2146_v6 }
  0xc1   :  { %v301_v13 = vpop.f32.mrf.mxu3  ;;  %v181_v7 = vpop.f32.mrf.mxu0 }
  0xc2   :  { %3197 = vst [vmem:[#allocation54_spill] sm:$0xff] %v2179_v16  ;;  %v2182_v29 = vadd.f32 %v301_v13, %v2121_v23  ;;  %v182_v15 = vadd.f32 %v181_v7, %v103_v14  ;;  %v222_v22 = vpop.f32.mrf.mxu1  ;;  %v400_v13 = vand.u32 127, %v380_v19  ;;  %v2261_v19 = vadd.f32 %v2099_v25, %v2103_v32 }
  0xc3   :  { %v2185_v61 = vadd.f32 %v222_v22, %v2103_v32 }
  0xc4   :  { %3198 = vst [vmem:[#allocation55_spill] sm:$0xff] %v2182_v29  ;;  %v2193_v40 = vsel %vm430_vm2, %v173_v10, %v182_v15  ;;  %v2205_v14 = vsel %vm430_vm2, %v182_v15, %v173_v10  ;;  %vm2241_vm5 = vcmp.lt.s32.totalorder %v400_v13, 64  ;;  %v3206_v29 = vmov 0 }
  0xc5   :  { %3199 = vst [vmem:[#allocation56_spill] sm:$0xff] %v2185_v61  ;;  %v3207_v29 = vsel %vm2241_vm5, 4294967295, %v3206_v29  ;;  %v434_v13 = vsel %vm430_vm2, %v2119_v50, %v2123_v42 }
  0xc6   :  { %3202 = vst [vmem:[#allocation57_spill] sm:$0xff] %v2205_v14 }
  0xc7   :  { %v257_v39 = vpop.f32.mrf.mxu2  ;;  %3208 = vst [vmem:[#allocation61_spill] sm:$0xff] %v3207_v29 }
  0xc8   :  { %v2217_v17 = vadd.f32 %v257_v39, %v2146_v6  ;;  %3211 = vst [vmem:[#allocation64_spill] sm:$0xff] %v2261_v19 }
  0xc9   :  { %v304_v7 = vpop.f32.mrf.mxu3 }
  0xca   :  { %3203 = vst [vmem:[#allocation58_spill] sm:$0xff] %v2217_v17  ;;  %v2220_v10 = vadd.f32 %v304_v7, %v2121_v23  ;;  %v225_v15 = vpop.f32.mrf.mxu1  ;;  %v455_v17 = vpop.f32.mrf.mxu0 }
  0xcb   :  { %v2223_v14 = vadd.f32 %v225_v15, %v2103_v32 }
  0xcc   :  { %3204 = vst [vmem:[#allocation59_spill] sm:$0xff] %v2220_v10  ;;  %v518_v10 = vadd.f32 %v455_v17, %v434_v13 }
  0xcd   :  { %3205 = vst [vmem:[#allocation60_spill] sm:$0xff] %v2223_v14 }
  0xcf   :  { %v260_v15 = vpop.f32.mrf.mxu2 }
  0xd0   :  { %v2246_v22 = vadd.f32 %v260_v15, %v2146_v6 }
  0xd1   :  { %v307_v3 = vpop.f32.mrf.mxu3 }
  0xd2   :  { %3209 = vst [vmem:[#allocation62_spill] sm:$0xff] %v2246_v22  ;;  %v2249_v39 = vadd.f32 %v307_v3, %v2121_v23  ;;  %v228_v24 = vpop.f32.mrf.mxu1 }
  0xd3   :  { %v2264_v15 = vadd.f32 %v228_v24, %v2103_v32  ;;  %v2283_v24 = vadd.f32 %v2105_v1, %v2121_v23 }
  0xd4   :  { %3210 = vst [vmem:[#allocation63_spill] sm:$0xff] %v2249_v39 }
  0xd5   :  { %3212 = vst [vmem:[#allocation65_spill] sm:$0xff] %v2264_v15 }
  0xd6   :  { %3214 = vst [vmem:[#allocation67_spill] sm:$0xff] %v2283_v24 }
  0xd7   :  { %v263_v25 = vpop.f32.mrf.mxu2 }
  0xd8   :  { %v2279_v22 = vadd.f32 %v263_v25, %v2146_v6 }
  0xd9   :  { %v310_v32 = vpop.f32.mrf.mxu3 }
  0xda   :  { %3213 = vst [vmem:[#allocation66_spill] sm:$0xff] %v2279_v22  ;;  %v2286_v3 = vadd.f32 %v310_v32, %v2121_v23  ;;  %v475_v1 = vpop.f32.mrf.mxu1  ;;  %v435_v23 = vsel %vm2154_vm3, %v2261_v19, %v2264_v15  ;;  %v2321_v15 = vadd.f32 %v2137_v26, %v2146_v6 }
  0xdb   :  { %v519_v18 = vadd.f32 %v475_v1, %v435_v23  ;;  %v522_v23 = vmul.f32 0.5, %v518_v10 }
  0xdc   :  { %3215 = vst [vmem:[#allocation68_spill] sm:$0xff] %v2286_v3 }
  0xdd   :  { %v526_v1 = vmul.f32 0.5, %v519_v18  ;;  %3217 = vst [vmem:[#allocation70_spill] sm:$0xff] %v2321_v15  ;;  %v437_v18 = vsel %vm2187_vm4, %v2283_v24, %v2286_v3 }
  0xdf   :  { %v266_v32 = vpop.f32.mrf.mxu2  ;;  %1417 = vtanh.f32 %v526_v1 }
  0xe0   :  { %v2305_v7 = vadd.f32 %v266_v32, %v2146_v6  ;;  %1419 = vtanh.f32 %v522_v23 }
  0xe1   :  { %v515_v42 = vpop.f32.mrf.mxu3 }
  0xe2   :  { %3216 = vst [vmem:[#allocation69_spill] sm:$0xff] %v2305_v7  ;;  %v521_v17 = vadd.f32 %v515_v42, %v437_v18  ;;  %v3253_v61 = vsel %vm2241_vm5, %v2149_v20, %v2305_v7  ;;  %v2668_v7 = vld [vmem:[#allocation4 + $0x48] sm:$0xff] }
  0xe5   :  { %v1418_v10 = vpop.eup %1417 }
  0xe6   :  { %v1420_v13 = vpop.eup %1419  ;;  %v528_v23 = vmul.f32 0.5, %v1418_v10 }
  0xe7   :  { %v269_v32 = vpop.f32.mrf.mxu2  ;;  %v524_v19 = vmul.f32 0.5, %v1420_v13  ;;  %v3252_v13 = vsel %vm2154_vm3, %v2109_v52, %v2223_v14 }
  0xe8   :  { %v2324_v38 = vadd.f32 %v269_v32, %v2146_v6  ;;  %v531_v32 = vmul.f32 0.5, %v521_v17  ;;  %v529_v50 = vadd.f32 0.5, %v528_v23 }
  0xe9   :  { %v525_v25 = vadd.f32 0.5, %v524_v19  ;;  %v3244_v19 = vld [vmem:[#allocation33_spill] sm:$0xff] }
  0xea   :  { %3218 = vst [vmem:[#allocation71_spill] sm:$0xff] %v2324_v38  ;;  %v436_v6 = vsel %vm2241_vm5, %v2321_v15, %v2324_v38  ;;  %v535_v22 = vmul.f32 0.0, %v529_v50  ;;  %v3250_v50 = vld [vmem:[#allocation37_spill] sm:$0xff] }
  0xef   :  { %v495_v26 = vpop.f32.mrf.mxu2 }
  0xf0   :  { %v520_v1 = vadd.f32 %v495_v26, %v436_v6  ;;  %v3251_v6 = vld [vmem:[#allocation41_spill] sm:$0xff] }
  0xf2   :  { %1421 = vtanh.f32 %v520_v1 }
  0xf3   :  { %1423 = vtanh.f32 %v531_v32 }
  0xf8   :  { %v1422_v28 = vpop.eup %1421 }
  0xf9   :  { %v536_v24 = vmul.f32 %v1422_v28, %v525_v25  ;;  %v1424_v42 = vpop.eup %1423  ;;  %v3241_v28 = vld [vmem:[#allocation38_spill] sm:$0xff]  ;;  %v3248_v25 = vld [vmem:[#allocation36_spill] sm:$0xff] }
  0xfa   :  { %v533_v3 = vmul.f32 0.5, %v1424_v42 }
  0xfb   :  { %v2338_v18 = vadd.f32 %v536_v24, %v535_v22  ;;  %v3243_v22 = vld [vmem:[#allocation23_spill] sm:$0xff] }
  0xfc   :  { %v534_v15 = vadd.f32 0.5, %v533_v3  ;;  %v3246_v3 = vld [vmem:[#allocation34_spill] sm:$0xff]  ;;  %v3247_v24 = vld [vmem:[#allocation27_spill] sm:$0xff] }
  0xfd   :  { %1425 = vtanh.f32 %v2338_v18 }
 0x103   :  { %v1426_v38 = vpop.eup %1425 }
 0x104   :  { %v539_v16 = vmul.f32 %v1426_v38, %v534_v15  ;;  %v3245_v15 = vld [vmem:[#allocation39_spill] sm:$0xff]  ;;  %v3249_v38 = vld [vmem:[#allocation40_spill] sm:$0xff] }
 0x106   :  { %560 = vmatmul.f32.vlgmr.msra.gmra.mxu0 %v539_v16  ;;  %580 = vmatmul.f32.vlgmr.msra.gmra.mxu1 %v539_v16 }
 0x107   :  { %600 = vmatmul.f32.vlgmr.msrb.gmra.mxu2 %v539_v16  ;;  %620 = vmatmul.f32.vlgmr.msra.gmra.mxu3 %v539_v16  ;;  %v3240_v16 = vld [vmem:[#allocation30_spill] sm:$0xff] }
 0x108   :  { %756 = vmatpush.msra.mxu0 %v3180_v46  ;;  %776 = vmatpush.msra.mxu1 %v1683_v27  ;;  %v3219_v27 = vld [vmem:[#allocation9_spill] sm:$0xff]  ;;  %v3242_v46 = vld [vmem:[#allocation31_spill] sm:$0xff] }
 0x109   :  { %796 = vmatpush.msrb.mxu2 %v1760_v53  ;;  %816 = vmatpush.msra.mxu3 %v1696_v31  ;;  %v3221_v31 = vld [vmem:[#allocation18_spill] sm:$0xff] }
 0x10a   :  { %757 = vmatpush.msra.mxu0 %v1701_v33  ;;  %777 = vmatpush.msra.mxu1 %v1694_v30  ;;  %v3220_v30 = vld [vmem:[#allocation12_spill] sm:$0xff]  ;;  %v3222_v33 = vld [vmem:[#allocation13_spill] sm:$0xff] }
 0x10b   :  { %797 = vmatpush.msrb.mxu2 %v1771_v55  ;;  %817 = vmatpush.msra.mxu3 %v1706_v35  ;;  %v3224_v35 = vld [vmem:[#allocation15_spill] sm:$0xff] }
 0x10c   :  { %758 = vmatpush.msra.mxu0 %v1709_v37  ;;  %778 = vmatpush.msra.mxu1 %v1704_v34  ;;  %v3223_v34 = vld [vmem:[#allocation10_spill] sm:$0xff]  ;;  %v3225_v37 = vld [vmem:[#allocation21_spill] sm:$0xff] }
 0x10d   :  { %798 = vmatpush.msrb.mxu2 %v1784_v59  ;;  %818 = vmatpush.msra.mxu3 %v1738_v45  ;;  %v3229_v45 = vld [vmem:[#allocation26_spill] sm:$0xff] }
 0x10e   :  { %759 = vmatpush.msra.mxu0 %v1726_v41  ;;  %779 = vmatpush.msra.mxu1 %v1732_v43  ;;  %v3226_v41 = vld [vmem:[#allocation16_spill] sm:$0xff]  ;;  %v3227_v43 = vld [vmem:[#allocation11_spill] sm:$0xff]  ;;  %3275 = vst [vmem:[#allocation26_spill] sm:$0xff] %v2668_v7 }
 0x10f   :  { %799 = vmatpush.msrb.mxu2 %v1795_v63  ;;  %819 = vmatpush.msra.mxu3 %v1748_v49  ;;  %v3232_v49 = vld [vmem:[#allocation24_spill] sm:$0xff] }
 0x110   :  { %760 = vmatpush.msra.mxu0 %v1736_v44  ;;  %780 = vmatpush.msra.mxu1 %v1743_v47  ;;  %v3228_v44 = vld [vmem:[#allocation20_spill] sm:$0xff]  ;;  %v3230_v47 = vld [vmem:[#allocation22_spill] sm:$0xff] }
 0x111   :  { %800 = vmatpush.msrb.mxu2 %v1808_v2  ;;  %820 = vmatpush.msra.mxu3 %v1773_v56  ;;  %v3235_v56 = vld [vmem:[#allocation17_spill] sm:$0xff] }
 0x112   :  { %761 = vmatpush.msra.mxu0 %v1745_v48  ;;  %781 = vmatpush.msra.mxu1 %v1752_v51  ;;  %v3231_v48 = vld [vmem:[#allocation14_spill] sm:$0xff]  ;;  %v3233_v51 = vld [vmem:[#allocation32_spill] sm:$0xff] }
 0x113   :  { %801 = vmatpush.msrb.mxu2 %v1820_v4  ;;  %821 = vmatpush.msra.mxu3 %v1787_v60  ;;  %v3238_v60 = vld [vmem:[#allocation29_spill] sm:$0xff] }
 0x114   :  { %762 = vmatpush.msra.mxu0 %v1764_v54  ;;  %782 = vmatpush.msra.mxu1 %v1780_v58  ;;  %v3234_v54 = vld [vmem:[#allocation25_spill] sm:$0xff]  ;;  %v3237_v58 = vld [vmem:[#allocation35_spill] sm:$0xff] }
 0x115   :  { %802 = vmatpush.msrb.mxu2 %v1834_v8  ;;  %822 = vmatpush.msra.mxu3 %v1799_v0 }
 0x116   :  { %763 = vmatpush.msra.mxu0 %v1778_v57  ;;  %783 = vmatpush.msra.mxu1 %v1793_v62  ;;  %v3236_v57 = vld [vmem:[#allocation28_spill] sm:$0xff]  ;;  %v3239_v62 = vld [vmem:[#allocation19_spill] sm:$0xff] }
 0x117   :  { %803 = vmatpush.msrb.mxu2 %v1845_v12  ;;  %823 = vmatpush.msra.mxu3 %v1822_v5 }
 0x118   :  { %764 = vmatpush.msra.mxu0 %v3219_v27  ;;  %784 = vmatpush.msra.mxu1 %v3220_v30 }
 0x119   :  { %804 = vmatpush.msrb.mxu2 %v3221_v31  ;;  %824 = vmatpush.msra.mxu3 %v3222_v33 }
 0x11a   :  { %765 = vmatpush.msra.mxu0 %v3223_v34  ;;  %785 = vmatpush.msra.mxu1 %v3224_v35 }
 0x11b   :  { %805 = vmatpush.msrb.mxu2 %v3225_v37  ;;  %825 = vmatpush.msra.mxu3 %v3226_v41 }
 0x11c   :  { %766 = vmatpush.msra.mxu0 %v3227_v43  ;;  %786 = vmatpush.msra.mxu1 %v3228_v44 }
 0x11d   :  { %806 = vmatpush.msrb.mxu2 %v3229_v45  ;;  %826 = vmatpush.msra.mxu3 %v3230_v47 }
 0x11e   :  { %767 = vmatpush.msra.mxu0 %v3231_v48  ;;  %787 = vmatpush.msra.mxu1 %v3232_v49 }
 0x11f   :  { %807 = vmatpush.msrb.mxu2 %v3233_v51  ;;  %827 = vmatpush.msra.mxu3 %v3234_v54 }
 0x120   :  { %768 = vmatpush.msra.mxu0 %v3235_v56  ;;  %788 = vmatpush.msra.mxu1 %v3236_v57 }
 0x121   :  { %808 = vmatpush.msrb.mxu2 %v3237_v58  ;;  %828 = vmatpush.msra.mxu3 %v3238_v60 }
 0x122   :  { %769 = vmatpush.msra.mxu0 %v3239_v62  ;;  %789 = vmatpush.msra.mxu1 %v3240_v16 }
 0x123   :  { %809 = vmatpush.msrb.mxu2 %v3241_v28  ;;  %829 = vmatpush.msra.mxu3 %v3242_v46 }
 0x124   :  { %770 = vmatpush.msra.mxu0 %v3243_v22  ;;  %790 = vmatpush.msra.mxu1 %v3244_v19 }
 0x125   :  { %810 = vmatpush.msrb.mxu2 %v3245_v15  ;;  %830 = vmatpush.msra.mxu3 %v3246_v3 }
 0x126   :  { %771 = vmatpush.msra.mxu0 %v3247_v24  ;;  %791 = vmatpush.msra.mxu1 %v3248_v25 }
 0x127   :  { %811 = vmatpush.msrb.mxu2 %v3249_v38  ;;  %831 = vmatpush.msra.mxu3 %v3250_v50 }
 0x183   :  { %v561_v17 = vpop.f32.mrf.mxu0  ;;  %v581_v10 = vpop.f32.mrf.mxu1 }
 0x184   :  { %v624_v26 = vadd.f32 %v561_v17, %v3251_v6  ;;  %v625_v1 = vadd.f32 %v581_v10, %v3252_v13  ;;  %v3254_v17 = vsel %vm2187_vm4, %v2126_v36, %v2249_v39  ;;  %v2665_v39 = vld [vmem:[#allocation4 + $0x40] sm:$0xff] }
 0x185   :  { %3274 = vst [vmem:[#allocation20_spill] sm:$0xff] %v2665_v39 }
 0x186   :  { %v628_v23 = vmul.f32 0.5, %v624_v26  ;;  %v632_v32 = vmul.f32 0.5, %v625_v1 }
 0x188   :  { %1427 = vtanh.f32 %v628_v23 }
 0x189   :  { %1429 = vtanh.f32 %v632_v32 }
 0x18a   :  { %v601_v42 = vpop.f32.mrf.mxu2  ;;  %v621_v27 = vpop.f32.mrf.mxu3 }
 0x18b   :  { %v626_v21 = vadd.f32 %v601_v42, %v3253_v61  ;;  %v627_v6 = vadd.f32 %v621_v27, %v3254_v17 }
 0x18d   :  { %1431 = vtanh.f32 %v626_v21  ;;  %v637_v10 = vmul.f32 0.5, %v627_v6  ;;  %v2425_v6 = vld [vmem:[#allocation4 + $0x1e0] sm:$0xff] }
 0x18e   :  { %v1428_v26 = vpop.eup %1427 }
 0x18f   :  { %v1430_v13 = vpop.eup %1429  ;;  %v630_v1 = vmul.f32 0.5, %v1428_v26  ;;  %1433 = vtanh.f32 %v637_v10  ;;  %v2428_v10 = vld [vmem:[#allocation4 + $0x1e8] sm:$0xff]  ;;  %v2455_v26 = vld [vmem:[#allocation4 + $0x180] sm:$0xff] }
 0x190   :  { %v634_v23 = vmul.f32 0.5, %v1430_v13  ;;  %v2462_v13 = vld [vmem:[#allocation4 + $0x198] sm:$0xff] }
 0x191   :  { %v631_v32 = vadd.f32 0.5, %v630_v1  ;;  %v2465_v1 = vld [vmem:[#allocation4 + $0x160] sm:$0xff] }
 0x192   :  { %v635_v52 = vadd.f32 0.5, %v634_v23  ;;  %v2472_v23 = vld [vmem:[#allocation4 + $0x178] sm:$0xff] }
 0x193   :  { %v1432_v14 = vpop.eup %1431 }
 0x194   :  { %v641_v29 = vmul.f32 %v635_v52, %v2338_v18  ;;  %v642_v20 = vmul.f32 %v1432_v14, %v631_v32  ;;  %v2432_v52 = vld [vmem:[#allocation4 + $0x1f8] sm:$0xff]  ;;  %v2445_v14 = vld [vmem:[#allocation4 + $0x1a0] sm:$0xff] }
 0x195   :  { %v1434_v61 = vpop.eup %1433  ;;  %v2452_v18 = vld [vmem:[#allocation4 + $0x1b8] sm:$0xff]  ;;  %v2475_v32 = vld [vmem:[#allocation4 + $0x140] sm:$0xff] }
 0x196   :  { %v2422_v42 = vadd.f32 %v642_v20, %v641_v29  ;;  %v639_v36 = vmul.f32 0.5, %v1434_v61  ;;  %v2438_v20 = vld [vmem:[#allocation4 + $0x1c8] sm:$0xff]  ;;  %v2442_v29 = vld [vmem:[#allocation4 + $0x1d8] sm:$0xff] }
 0x197   :  { %v2482_v61 = vld [vmem:[#allocation4 + $0x158] sm:$0xff] }
 0x198   :  { %1435 = vtanh.f32 %v2422_v42  ;;  %v640_v27 = vadd.f32 0.5, %v639_v36  ;;  %v2435_v36 = vld [vmem:[#allocation4 + $0x1c0] sm:$0xff] }
 0x19e   :  { %v1436_v21 = vpop.eup %1435 }
 0x19f   :  { %v645_v17 = vmul.f32 %v1436_v21, %v640_v27  ;;  %v2485_v27 = vld [vmem:[#allocation4 + $0x120] sm:$0xff] }
 0x1a0   :  { %v2493_v21 = vld [vmem:[#allocation4 + $0x100] sm:$0xff] }
 0x1a1   :  { %666 = vmatmul.f32.vlgmr.msrb.gmra.mxu0 %v645_v17  ;;  %686 = vmatmul.f32.vlgmr.msrb.gmra.mxu1 %v645_v17 }
 0x1a2   :  { %706 = vmatmul.f32.vlgmr.msra.gmra.mxu2 %v645_v17  ;;  %726 = vmatmul.f32.vlgmr.msrb.gmra.mxu3 %v645_v17  ;;  %v2501_v17 = vld [vmem:[#allocation4 + $0xe0] sm:$0xff] }
 0x1a3   :  { %862 = vmatpush.msrb.mxu0 %v2425_v6  ;;  %882 = vmatpush.msrb.mxu1 %v2428_v10 }
 0x1a4   :  { %902 = vmatpush.msra.mxu2 %v1760_v53  ;;  %922 = vmatpush.msrb.mxu3 %v2432_v52  ;;  %v2448_v53 = vld [vmem:[#allocation4 + $0x1a8] sm:$0xff] }
 0x1a5   :  { %863 = vmatpush.msrb.mxu0 %v2435_v36  ;;  %883 = vmatpush.msrb.mxu1 %v2438_v20 }
 0x1a6   :  { %903 = vmatpush.msra.mxu2 %v1771_v55  ;;  %923 = vmatpush.msrb.mxu3 %v2442_v29  ;;  %v2458_v55 = vld [vmem:[#allocation4 + $0x188] sm:$0xff] }
 0x1a7   :  { %864 = vmatpush.msrb.mxu0 %v2445_v14  ;;  %884 = vmatpush.msrb.mxu1 %v2448_v53 }
 0x1a8   :  { %904 = vmatpush.msra.mxu2 %v1784_v59  ;;  %924 = vmatpush.msrb.mxu3 %v2452_v18  ;;  %v2468_v59 = vld [vmem:[#allocation4 + $0x168] sm:$0xff] }
 0x1a9   :  { %865 = vmatpush.msrb.mxu0 %v2455_v26  ;;  %885 = vmatpush.msrb.mxu1 %v2458_v55 }
 0x1aa   :  { %905 = vmatpush.msra.mxu2 %v1795_v63  ;;  %925 = vmatpush.msrb.mxu3 %v2462_v13  ;;  %v2478_v63 = vld [vmem:[#allocation4 + $0x148] sm:$0xff] }
 0x1ab   :  { %866 = vmatpush.msrb.mxu0 %v2465_v1  ;;  %886 = vmatpush.msrb.mxu1 %v2468_v59 }
 0x1ac   :  { %906 = vmatpush.msra.mxu2 %v1808_v2  ;;  %926 = vmatpush.msrb.mxu3 %v2472_v23  ;;  %v2488_v2 = vld [vmem:[#allocation4 + $0x128] sm:$0xff] }
 0x1ad   :  { %867 = vmatpush.msrb.mxu0 %v2475_v32  ;;  %887 = vmatpush.msrb.mxu1 %v2478_v63 }
 0x1ae   :  { %907 = vmatpush.msra.mxu2 %v1820_v4  ;;  %927 = vmatpush.msrb.mxu3 %v2482_v61  ;;  %v2496_v4 = vld [vmem:[#allocation4 + $0x108] sm:$0xff] }
 0x1af   :  { %868 = vmatpush.msrb.mxu0 %v2485_v27  ;;  %888 = vmatpush.msrb.mxu1 %v2488_v2 }
 0x1b0   :  { %908 = vmatpush.msra.mxu2 %v1834_v8  ;;  %928 = vmatpush.msrb.mxu3 %v1799_v0 }
 0x1b1   :  { %869 = vmatpush.msrb.mxu0 %v2493_v21  ;;  %889 = vmatpush.msrb.mxu1 %v2496_v4 }
 0x1b2   :  { %909 = vmatpush.msra.mxu2 %v1845_v12  ;;  %929 = vmatpush.msrb.mxu3 %v1822_v5  ;;  %v3255_v12 = vld [vmem:[#allocation45_spill] sm:$0xff] }
 0x1b3   :  { %870 = vmatpush.msrb.mxu0 %v2501_v17  ;;  %890 = vmatpush.msrb.mxu1 %v3220_v30  ;;  %v3256_v30 = vld [vmem:[#allocation56_spill] sm:$0xff] }
 0x1b4   :  { %910 = vmatpush.msra.mxu2 %v3221_v31  ;;  %930 = vmatpush.msrb.mxu3 %v3222_v33  ;;  %v3257_v31 = vsel %vm2154_vm3, %v3255_v12, %v3256_v30  ;;  %v2683_v12 = vld [vmem:[#allocation4 + $0x30] sm:$0xff]  ;;  %v2686_v30 = vld [vmem:[#allocation4 + $0x38] sm:$0xff] }
 0x1b5   :  { %871 = vmatpush.msrb.mxu0 %v3223_v34  ;;  %891 = vmatpush.msrb.mxu1 %v3224_v35  ;;  %3280 = vst [vmem:[#allocation25_spill] sm:$0xff] %v2683_v12 }
 0x1b6   :  { %911 = vmatpush.msra.mxu2 %v3225_v37  ;;  %931 = vmatpush.msrb.mxu3 %v3226_v41  ;;  %3281 = vst [vmem:[#allocation17_spill] sm:$0xff] %v2686_v30 }
 0x1b7   :  { %872 = vmatpush.msrb.mxu0 %v3227_v43  ;;  %892 = vmatpush.msrb.mxu1 %v3228_v44  ;;  %v3259_v44 = vld [vmem:[#allocation54_spill] sm:$0xff] }
 0x1b8   :  { %912 = vmatpush.msra.mxu2 %v3229_v45  ;;  %932 = vmatpush.msrb.mxu3 %v3230_v47  ;;  %v3260_v45 = vld [vmem:[#allocation66_spill] sm:$0xff] }
 0x1b9   :  { %873 = vmatpush.msrb.mxu0 %v3231_v48  ;;  %893 = vmatpush.msrb.mxu1 %v3232_v49  ;;  %v3261_v47 = vsel %vm2241_vm5, %v3259_v44, %v3260_v45  ;;  %v3263_v49 = vld [vmem:[#allocation59_spill] sm:$0xff]  ;;  %v2677_v44 = vld [vmem:[#allocation4 + $0x20] sm:$0xff]  ;;  %v2680_v45 = vld [vmem:[#allocation4 + $0x28] sm:$0xff] }
 0x1ba   :  { %913 = vmatpush.msra.mxu2 %v3233_v51  ;;  %933 = vmatpush.msrb.mxu3 %v3234_v54  ;;  %3278 = vst [vmem:[#allocation24_spill] sm:$0xff] %v2677_v44 }
 0x1bb   :  { %874 = vmatpush.msrb.mxu0 %v3235_v56  ;;  %894 = vmatpush.msrb.mxu1 %v3236_v57  ;;  %3279 = vst [vmem:[#allocation32_spill] sm:$0xff] %v2680_v45 }
 0x1bc   :  { %914 = vmatpush.msra.mxu2 %v3237_v58  ;;  %934 = vmatpush.msrb.mxu3 %v3238_v60 }
 0x1bd   :  { %875 = vmatpush.msrb.mxu0 %v3239_v62  ;;  %895 = vmatpush.msrb.mxu1 %v3240_v16 }
 0x1be   :  { %915 = vmatpush.msra.mxu2 %v3241_v28  ;;  %935 = vmatpush.msrb.mxu3 %v3242_v46 }
 0x1bf   :  { %876 = vmatpush.msrb.mxu0 %v3243_v22  ;;  %896 = vmatpush.msrb.mxu1 %v3244_v19 }
 0x1c0   :  { %916 = vmatpush.msra.mxu2 %v3245_v15  ;;  %936 = vmatpush.msrb.mxu3 %v3246_v3 }
 0x1c1   :  { %877 = vmatpush.msrb.mxu0 %v3247_v24  ;;  %897 = vmatpush.msrb.mxu1 %v3248_v25 }
 0x1c2   :  { %917 = vmatpush.msra.mxu2 %v3249_v38  ;;  %937 = vmatpush.msrb.mxu3 %v3250_v50 }
 0x21e   :  { %v667_v0 = vpop.f32.mrf.mxu0  ;;  %v687_v5 = vpop.f32.mrf.mxu1 }
 0x21f   :  { %v730_v8 = vadd.f32 %v667_v0, %v2193_v40  ;;  %v731_v33 = vadd.f32 %v687_v5, %v3257_v31  ;;  %v3262_v40 = vld [vmem:[#allocation46_spill] sm:$0xff] }
 0x220   :  { %v3264_v51 = vsel %vm2187_vm4, %v3262_v40, %v3263_v49  ;;  %v2557_v0 = vld [vmem:[#allocation4 + $0x1f0] sm:$0xff]  ;;  %v2674_v49 = vld [vmem:[#allocation4 + $0x58] sm:$0xff] }
 0x221   :  { %v734_v34 = vmul.f32 0.5, %v730_v8  ;;  %v738_v35 = vmul.f32 0.5, %v731_v33  ;;  %v2569_v5 = vld [vmem:[#allocation4 + $0x1b0] sm:$0xff]  ;;  %3277 = vst [vmem:[#allocation14_spill] sm:$0xff] %v2674_v49 }
 0x222   :  { %v2575_v8 = vld [vmem:[#allocation4 + $0x190] sm:$0xff] }
 0x223   :  { %1437 = vtanh.f32 %v734_v34  ;;  %v2581_v31 = vld [vmem:[#allocation4 + $0x170] sm:$0xff] }
 0x224   :  { %1439 = vtanh.f32 %v738_v35  ;;  %v2587_v33 = vld [vmem:[#allocation4 + $0x150] sm:$0xff]  ;;  %v2596_v35 = vld [vmem:[#allocation4 + $0x138] sm:$0xff] }
 0x225   :  { %v707_v37 = vpop.f32.mrf.mxu2  ;;  %v727_v41 = vpop.f32.mrf.mxu3  ;;  %v2593_v34 = vld [vmem:[#allocation4 + $0x130] sm:$0xff] }
 0x226   :  { %v732_v48 = vadd.f32 %v707_v37, %v3261_v47  ;;  %v733_v54 = vadd.f32 %v727_v41, %v3264_v51  ;;  %v2601_v37 = vld [vmem:[#allocation4 + $0x110] sm:$0xff]  ;;  %v2604_v41 = vld [vmem:[#allocation4 + $0x118] sm:$0xff]  ;;  %v2608_v47 = vld [vmem:[#allocation4 + $0xe8] sm:$0xff] }
 0x227   :  { %v2614_v51 = vld [vmem:[#allocation4 + $0xf8] sm:$0xff]  ;;  %v2671_v40 = vld [vmem:[#allocation4 + $0x50] sm:$0xff] }
 0x228   :  { %1441 = vtanh.f32 %v732_v48  ;;  %v743_v56 = vmul.f32 0.5, %v733_v54  ;;  %v2611_v48 = vld [vmem:[#allocation4 + $0xf0] sm:$0xff]  ;;  %v2617_v54 = vld [vmem:[#allocation4 + $0xc0] sm:$0xff]  ;;  %3276 = vst [vmem:[#allocation22_spill] sm:$0xff] %v2671_v40 }
 0x229   :  { %v1438_v57 = vpop.eup %1437 }
 0x22a   :  { %v1440_v58 = vpop.eup %1439  ;;  %v736_v60 = vmul.f32 0.5, %v1438_v57  ;;  %1443 = vtanh.f32 %v743_v56  ;;  %v2620_v56 = vld [vmem:[#allocation4 + $0xc8] sm:$0xff]  ;;  %v2623_v57 = vld [vmem:[#allocation4 + $0xd0] sm:$0xff] }
 0x22b   :  { %v740_v62 = vmul.f32 0.5, %v1440_v58  ;;  %v2626_v58 = vld [vmem:[#allocation4 + $0xd8] sm:$0xff] }
 0x22c   :  { %v737_v16 = vadd.f32 0.5, %v736_v60  ;;  %v2629_v60 = vld [vmem:[#allocation4 + $0xa0] sm:$0xff] }
 0x22d   :  { %v741_v28 = vadd.f32 0.5, %v740_v62  ;;  %v2632_v62 = vld [vmem:[#allocation4 + $0xa8] sm:$0xff] }
 0x22e   :  { %v1442_v46 = vpop.eup %1441 }
 0x22f   :  { %v747_v22 = vmul.f32 %v741_v28, %v2422_v42  ;;  %v748_v19 = vmul.f32 %v1442_v46, %v737_v16  ;;  %v2563_v42 = vld [vmem:[#allocation4 + $0x1d0] sm:$0xff]  ;;  %v2638_v28 = vld [vmem:[#allocation4 + $0xb8] sm:$0xff]  ;;  %v2641_v46 = vld [vmem:[#allocation4 + $0x80] sm:$0xff] }
 0x230   :  { %v1444_v15 = vpop.eup %1443  ;;  %v2635_v16 = vld [vmem:[#allocation4 + $0xb0] sm:$0xff]  ;;  %3265 = vst [vmem:[#allocation9_spill] sm:$0xff] %v2638_v28 }
 0x231   :  { %v2552_v3 = vadd.f32 %v748_v19, %v747_v22  ;;  %v745_v24 = vmul.f32 0.5, %v1444_v15  ;;  %3266 = vst [vmem:[#allocation12_spill] sm:$0xff] %v2641_v46  ;;  %v2644_v22 = vld [vmem:[#allocation4 + $0x88] sm:$0xff]  ;;  %v2647_v19 = vld [vmem:[#allocation4 + $0x90] sm:$0xff]  ;;  %v2650_v15 = vld [vmem:[#allocation4 + $0x98] sm:$0xff] }
 0x232   :  { %3267 = vst [vmem:[#allocation18_spill] sm:$0xff] %v2644_v22 }
 0x233   :  { %1445 = vtanh.f32 %v2552_v3  ;;  %v746_v25 = vadd.f32 0.5, %v745_v24  ;;  %3268 = vst [vmem:[#allocation13_spill] sm:$0xff] %v2647_v19  ;;  %v2653_v24 = vld [vmem:[#allocation4 + $0x60] sm:$0xff] }
 0x234   :  { %3269 = vst [vmem:[#allocation10_spill] sm:$0xff] %v2650_v15 }
 0x235   :  { %3270 = vst [vmem:[#allocation15_spill] sm:$0xff] %v2653_v24 }
 0x239   :  { %v1446_v38 = vpop.eup %1445 }
 0x23a   :  { %v751_v50 = vmul.f32 %v1446_v38, %v746_v25  ;;  %v2656_v25 = vld [vmem:[#allocation4 + $0x68] sm:$0xff]  ;;  %v2659_v38 = vld [vmem:[#allocation4 + $0x70] sm:$0xff] }
 0x23b   :  { %3271 = vst [vmem:[#allocation21_spill] sm:$0xff] %v2656_v25 }
 0x23c   :  { %772 = vmatmul.f32.vlgmr.msra.gmra.mxu0 %v751_v50  ;;  %792 = vmatmul.f32.vlgmr.msra.gmra.mxu1 %v751_v50  ;;  %3272 = vst [vmem:[#allocation16_spill] sm:$0xff] %v2659_v38 }
 0x23d   :  { %812 = vmatmul.f32.vlgmr.msrb.gmra.mxu2 %v751_v50  ;;  %832 = vmatmul.f32.vlgmr.msra.gmra.mxu3 %v751_v50  ;;  %v2662_v50 = vld [vmem:[#allocation4 + $0x78] sm:$0xff] }
 0x23e   :  { %968 = vmatpush.msra.mxu0 %v2425_v6  ;;  %988 = vmatpush.msra.mxu1 %v2428_v10  ;;  %3273 = vst [vmem:[#allocation11_spill] sm:$0xff] %v2662_v50 }
 0x23f   :  { %1008 = vmatpush.msrb.mxu2 %v2557_v0  ;;  %1028 = vmatpush.msra.mxu3 %v2432_v52 }
 0x240   :  { %969 = vmatpush.msra.mxu0 %v2435_v36  ;;  %989 = vmatpush.msra.mxu1 %v2438_v20 }
 0x241   :  { %1009 = vmatpush.msrb.mxu2 %v2563_v42  ;;  %1029 = vmatpush.msra.mxu3 %v2442_v29 }
 0x242   :  { %970 = vmatpush.msra.mxu0 %v2445_v14  ;;  %990 = vmatpush.msra.mxu1 %v2448_v53 }
 0x243   :  { %1010 = vmatpush.msrb.mxu2 %v2569_v5  ;;  %1030 = vmatpush.msra.mxu3 %v2452_v18 }
 0x244   :  { %971 = vmatpush.msra.mxu0 %v2455_v26  ;;  %991 = vmatpush.msra.mxu1 %v2458_v55 }
 0x245   :  { %1011 = vmatpush.msrb.mxu2 %v2575_v8  ;;  %1031 = vmatpush.msra.mxu3 %v2462_v13 }
 0x246   :  { %972 = vmatpush.msra.mxu0 %v2465_v1  ;;  %992 = vmatpush.msra.mxu1 %v2468_v59 }
 0x247   :  { %1012 = vmatpush.msrb.mxu2 %v2581_v31  ;;  %1032 = vmatpush.msra.mxu3 %v2472_v23 }
 0x248   :  { %973 = vmatpush.msra.mxu0 %v2475_v32  ;;  %993 = vmatpush.msra.mxu1 %v2478_v63 }
 0x249   :  { %1013 = vmatpush.msrb.mxu2 %v2587_v33  ;;  %1033 = vmatpush.msra.mxu3 %v2482_v61 }
 0x24a   :  { %974 = vmatpush.msra.mxu0 %v2485_v27  ;;  %994 = vmatpush.msra.mxu1 %v2488_v2 }
 0x24b   :  { %1014 = vmatpush.msrb.mxu2 %v2593_v34  ;;  %1034 = vmatpush.msra.mxu3 %v2596_v35 }
 0x24c   :  { %975 = vmatpush.msra.mxu0 %v2493_v21  ;;  %995 = vmatpush.msra.mxu1 %v2496_v4 }
 0x24d   :  { %1015 = vmatpush.msrb.mxu2 %v2601_v37  ;;  %1035 = vmatpush.msra.mxu3 %v2604_v41 }
 0x24e   :  { %976 = vmatpush.msra.mxu0 %v2501_v17  ;;  %996 = vmatpush.msra.mxu1 %v2608_v47 }
 0x24f   :  { %1016 = vmatpush.msrb.mxu2 %v2611_v48  ;;  %1036 = vmatpush.msra.mxu3 %v2614_v51 }
 0x250   :  { %977 = vmatpush.msra.mxu0 %v2617_v54  ;;  %997 = vmatpush.msra.mxu1 %v2620_v56 }
 0x251   :  { %1017 = vmatpush.msrb.mxu2 %v2623_v57  ;;  %1037 = vmatpush.msra.mxu3 %v2626_v58 }
 0x252   :  { %978 = vmatpush.msra.mxu0 %v2629_v60  ;;  %998 = vmatpush.msra.mxu1 %v2632_v62 }
 0x253   :  { %1018 = vmatpush.msrb.mxu2 %v2635_v16  ;;  %1038 = vmatpush.msra.mxu3 %v2638_v28 }
 0x254   :  { %979 = vmatpush.msra.mxu0 %v2641_v46  ;;  %999 = vmatpush.msra.mxu1 %v2644_v22 }
 0x255   :  { %1019 = vmatpush.msrb.mxu2 %v2647_v19  ;;  %1039 = vmatpush.msra.mxu3 %v2650_v15  ;;  %v3290_v19 = vld [vmem:[#allocation58_spill] sm:$0xff] }
 0x256   :  { %980 = vmatpush.msra.mxu0 %v2653_v24  ;;  %1000 = vmatpush.msra.mxu1 %v2656_v25 }
 0x257   :  { %1020 = vmatpush.msrb.mxu2 %v2659_v38  ;;  %1040 = vmatpush.msra.mxu3 %v2662_v50  ;;  %v3287_v50 = vld [vmem:[#allocation47_spill] sm:$0xff] }
 0x258   :  { %981 = vmatpush.msra.mxu0 %v2665_v39  ;;  %1001 = vmatpush.msra.mxu1 %v2668_v7  ;;  %v3286_v39 = vld [vmem:[#allocation52_spill] sm:$0xff] }
 0x259   :  { %1021 = vmatpush.msrb.mxu2 %v2671_v40  ;;  %1041 = vmatpush.msra.mxu3 %v2674_v49  ;;  %v2689_v40 = vld [vmem:[#allocation4] sm:$0xff]  ;;  %v2692_v49 = vld [vmem:[#allocation4 + $0x8] sm:$0xff] }
 0x25a   :  { %982 = vmatpush.msra.mxu0 %v2677_v44  ;;  %1002 = vmatpush.msra.mxu1 %v2680_v45  ;;  %3282 = vst [vmem:[#allocation28_spill] sm:$0xff] %v2689_v40  ;;  %v2695_v44 = vld [vmem:[#allocation4 + $0x10] sm:$0xff]  ;;  %v2698_v45 = vld [vmem:[#allocation4 + $0x18] sm:$0xff] }
 0x25b   :  { %1022 = vmatpush.msrb.mxu2 %v2683_v12  ;;  %1042 = vmatpush.msra.mxu3 %v2686_v30  ;;  %3283 = vst [vmem:[#allocation35_spill] sm:$0xff] %v2692_v49 }
 0x25c   :  { %983 = vmatpush.msra.mxu0 %v2689_v40  ;;  %1003 = vmatpush.msra.mxu1 %v2692_v49  ;;  %3284 = vst [vmem:[#allocation29_spill] sm:$0xff] %v2695_v44  ;;  %v3288_v40 = vld [vmem:[#allocation51_spill] sm:$0xff] }
 0x25d   :  { %1023 = vmatpush.msrb.mxu2 %v2695_v44  ;;  %3285 = vst [vmem:[#allocation19_spill] sm:$0xff] %v2698_v45  ;;  %1043 = vmatpush.msra.mxu3 %v2698_v45  ;;  %v3289_v38 = vsel %vm2154_vm3, %v3287_v50, %v3288_v40  ;;  %v3291_v45 = vld [vmem:[#allocation62_spill] sm:$0xff] }
 0x25e   :  { %v3292_v22 = vsel %vm2241_vm5, %v3290_v19, %v3291_v45 }
 0x2b9   :  { %v773_v12 = vpop.f32.mrf.mxu0  ;;  %v793_v7 = vpop.f32.mrf.mxu1 }
 0x2ba   :  { %v836_v30 = vadd.f32 %v773_v12, %v3286_v39  ;;  %v837_v25 = vadd.f32 %v793_v7, %v3289_v38  ;;  %v3293_v39 = vld [vmem:[#allocation49_spill] sm:$0xff]  ;;  %v3294_v12 = vld [vmem:[#allocation55_spill] sm:$0xff] }
 0x2bb   :  { %v3295_v9 = vsel %vm2187_vm4, %v3293_v39, %v3294_v12 }
 0x2bc   :  { %v840_v24 = vmul.f32 0.5, %v836_v30  ;;  %v844_v49 = vmul.f32 0.5, %v837_v25 }
 0x2be   :  { %1447 = vtanh.f32 %v840_v24 }
 0x2bf   :  { %1449 = vtanh.f32 %v844_v49 }
 0x2c0   :  { %v813_v15 = vpop.f32.mrf.mxu2  ;;  %v833_v44 = vpop.f32.mrf.mxu3 }
 0x2c1   :  { %v838_v46 = vadd.f32 %v813_v15, %v3292_v22  ;;  %v839_v28 = vadd.f32 %v833_v44, %v3295_v9 }
 0x2c3   :  { %1451 = vtanh.f32 %v838_v46  ;;  %v849_v7 = vmul.f32 0.5, %v839_v28  ;;  %v3299_v46 = vld [vmem:[#allocation13_spill] sm:$0xff] }
 0x2c4   :  { %v1448_v30 = vpop.eup %1447 }
 0x2c5   :  { %v1450_v25 = vpop.eup %1449  ;;  %v842_v24 = vmul.f32 0.5, %v1448_v30  ;;  %1453 = vtanh.f32 %v849_v7  ;;  %v3303_v7 = vld [vmem:[#allocation16_spill] sm:$0xff]  ;;  %v3304_v30 = vld [vmem:[#allocation11_spill] sm:$0xff] }
 0x2c6   :  { %v846_v49 = vmul.f32 0.5, %v1450_v25  ;;  %v3305_v25 = vld [vmem:[#allocation20_spill] sm:$0xff] }
 0x2c7   :  { %v843_v38 = vadd.f32 0.5, %v842_v24  ;;  %v3306_v24 = vld [vmem:[#allocation26_spill] sm:$0xff] }
 0x2c8   :  { %v847_v50 = vadd.f32 0.5, %v846_v49  ;;  %v3307_v49 = vld [vmem:[#allocation22_spill] sm:$0xff] }
 0x2c9   :  { %v1452_v43 = vpop.eup %1451 }
 0x2ca   :  { %v853_v40 = vmul.f32 %v847_v50, %v2552_v3  ;;  %v854_v19 = vmul.f32 %v1452_v43, %v843_v38  ;;  %v3296_v43 = vld [vmem:[#allocation9_spill] sm:$0xff]  ;;  %v3298_v3 = vld [vmem:[#allocation18_spill] sm:$0xff]  ;;  %v3301_v50 = vld [vmem:[#allocation15_spill] sm:$0xff] }
 0x2cb   :  { %v1454_v22 = vpop.eup %1453  ;;  %v3308_v38 = vld [vmem:[#allocation14_spill] sm:$0xff] }
 0x2cc   :  { %v2718_v15 = vadd.f32 %v854_v19, %v853_v40  ;;  %v851_v39 = vmul.f32 0.5, %v1454_v22  ;;  %v3297_v40 = vld [vmem:[#allocation12_spill] sm:$0xff]  ;;  %v3300_v19 = vld [vmem:[#allocation10_spill] sm:$0xff] }
 0x2cd   :  { %v3309_v22 = vld [vmem:[#allocation24_spill] sm:$0xff] }
 0x2ce   :  { %1455 = vtanh.f32 %v2718_v15  ;;  %v852_v9 = vadd.f32 0.5, %v851_v39  ;;  %v3302_v39 = vld [vmem:[#allocation21_spill] sm:$0xff] }
 0x2d4   :  { %v1456_v44 = vpop.eup %1455 }
 0x2d5   :  { %v857_v28 = vmul.f32 %v1456_v44, %v852_v9  ;;  %v3310_v9 = vld [vmem:[#allocation32_spill] sm:$0xff]  ;;  %v3311_v44 = vld [vmem:[#allocation25_spill] sm:$0xff] }
 0x2d7   :  { %878 = vmatmul.f32.vlgmr.msrb.gmra.mxu0 %v857_v28  ;;  %898 = vmatmul.f32.vlgmr.msrb.gmra.mxu1 %v857_v28 }
 0x2d8   :  { %918 = vmatmul.f32.vlgmr.msra.gmra.mxu2 %v857_v28  ;;  %938 = vmatmul.f32.vlgmr.msrb.gmra.mxu3 %v857_v28  ;;  %v3312_v28 = vld [vmem:[#allocation17_spill] sm:$0xff] }
 0x2d9   :  { %1074 = vmatpush.msrb.mxu0 %v2425_v6  ;;  %1094 = vmatpush.msrb.mxu1 %v2428_v10 }
 0x2da   :  { %1114 = vmatpush.msra.mxu2 %v2557_v0  ;;  %1134 = vmatpush.msrb.mxu3 %v2432_v52 }
 0x2db   :  { %1075 = vmatpush.msrb.mxu0 %v2435_v36  ;;  %1095 = vmatpush.msrb.mxu1 %v2438_v20 }
 0x2dc   :  { %1115 = vmatpush.msra.mxu2 %v2563_v42  ;;  %1135 = vmatpush.msrb.mxu3 %v2442_v29 }
 0x2dd   :  { %1076 = vmatpush.msrb.mxu0 %v2445_v14  ;;  %1096 = vmatpush.msrb.mxu1 %v2448_v53 }
 0x2de   :  { %1116 = vmatpush.msra.mxu2 %v2569_v5  ;;  %1136 = vmatpush.msrb.mxu3 %v2452_v18 }
 0x2df   :  { %1077 = vmatpush.msrb.mxu0 %v2455_v26  ;;  %1097 = vmatpush.msrb.mxu1 %v2458_v55 }
 0x2e0   :  { %1117 = vmatpush.msra.mxu2 %v2575_v8  ;;  %1137 = vmatpush.msrb.mxu3 %v2462_v13 }
 0x2e1   :  { %1078 = vmatpush.msrb.mxu0 %v2465_v1  ;;  %1098 = vmatpush.msrb.mxu1 %v2468_v59 }
 0x2e2   :  { %1118 = vmatpush.msra.mxu2 %v2581_v31  ;;  %1138 = vmatpush.msrb.mxu3 %v2472_v23 }
 0x2e3   :  { %1079 = vmatpush.msrb.mxu0 %v2475_v32  ;;  %1099 = vmatpush.msrb.mxu1 %v2478_v63 }
 0x2e4   :  { %1119 = vmatpush.msra.mxu2 %v2587_v33  ;;  %1139 = vmatpush.msrb.mxu3 %v2482_v61 }
 0x2e5   :  { %1080 = vmatpush.msrb.mxu0 %v2485_v27  ;;  %1100 = vmatpush.msrb.mxu1 %v2488_v2 }
 0x2e6   :  { %1120 = vmatpush.msra.mxu2 %v2593_v34  ;;  %1140 = vmatpush.msrb.mxu3 %v2596_v35 }
 0x2e7   :  { %1081 = vmatpush.msrb.mxu0 %v2493_v21  ;;  %1101 = vmatpush.msrb.mxu1 %v2496_v4 }
 0x2e8   :  { %1121 = vmatpush.msra.mxu2 %v2601_v37  ;;  %1141 = vmatpush.msrb.mxu3 %v2604_v41 }
 0x2e9   :  { %1082 = vmatpush.msrb.mxu0 %v2501_v17  ;;  %1102 = vmatpush.msrb.mxu1 %v2608_v47 }
 0x2ea   :  { %1122 = vmatpush.msra.mxu2 %v2611_v48  ;;  %1142 = vmatpush.msrb.mxu3 %v2614_v51 }
 0x2eb   :  { %1083 = vmatpush.msrb.mxu0 %v2617_v54  ;;  %1103 = vmatpush.msrb.mxu1 %v2620_v56 }
 0x2ec   :  { %1123 = vmatpush.msra.mxu2 %v2623_v57  ;;  %1143 = vmatpush.msrb.mxu3 %v2626_v58 }
 0x2ed   :  { %1084 = vmatpush.msrb.mxu0 %v2629_v60  ;;  %1104 = vmatpush.msrb.mxu1 %v2632_v62 }
 0x2ee   :  { %1124 = vmatpush.msra.mxu2 %v2635_v16  ;;  %1144 = vmatpush.msrb.mxu3 %v3296_v43 }
 0x2ef   :  { %1085 = vmatpush.msrb.mxu0 %v3297_v40  ;;  %1105 = vmatpush.msrb.mxu1 %v3298_v3 }
 0x2f0   :  { %1125 = vmatpush.msra.mxu2 %v3299_v46  ;;  %1145 = vmatpush.msrb.mxu3 %v3300_v19 }
 0x2f1   :  { %1086 = vmatpush.msrb.mxu0 %v3301_v50  ;;  %1106 = vmatpush.msrb.mxu1 %v3302_v39  ;;  %v3313_v39 = vld [vmem:[#allocation28_spill] sm:$0xff]  ;;  %v3317_v50 = vld [vmem:[#allocation53_spill] sm:$0xff] }
 0x2f2   :  { %1126 = vmatpush.msra.mxu2 %v3303_v7  ;;  %1146 = vmatpush.msrb.mxu3 %v3304_v30  ;;  %v3314_v7 = vld [vmem:[#allocation35_spill] sm:$0xff]  ;;  %v3315_v30 = vld [vmem:[#allocation29_spill] sm:$0xff] }
 0x2f3   :  { %1087 = vmatpush.msrb.mxu0 %v3305_v25  ;;  %1107 = vmatpush.msrb.mxu1 %v3306_v24  ;;  %v3316_v25 = vld [vmem:[#allocation19_spill] sm:$0xff] }
 0x2f4   :  { %1127 = vmatpush.msra.mxu2 %v3307_v49  ;;  %1147 = vmatpush.msrb.mxu3 %v3308_v38 }
 0x2f5   :  { %1088 = vmatpush.msrb.mxu0 %v3309_v22  ;;  %1108 = vmatpush.msrb.mxu1 %v3310_v9  ;;  %v3319_v22 = vld [vmem:[#allocation51_spill] sm:$0xff] }
 0x2f6   :  { %1128 = vmatpush.msra.mxu2 %v3311_v44  ;;  %1148 = vmatpush.msrb.mxu3 %v3312_v28  ;;  %v3320_v9 = vld [vmem:[#allocation47_spill] sm:$0xff] }
 0x2f7   :  { %1089 = vmatpush.msrb.mxu0 %v3313_v39  ;;  %1109 = vmatpush.msrb.mxu1 %v3314_v7  ;;  %v3321_v46 = vsel %vm2154_vm3, %v3319_v22, %v3320_v9 }
 0x2f8   :  { %1129 = vmatpush.msra.mxu2 %v3315_v30  ;;  %1149 = vmatpush.msrb.mxu3 %v3316_v25  ;;  %v3323_v25 = vld [vmem:[#allocation58_spill] sm:$0xff] }
 0x2f9   :  { %v3324_v30 = vsel %vm2241_vm5, %v3291_v45, %v3323_v25 }
 0x354   :  { %v879_v24 = vpop.f32.mrf.mxu0  ;;  %v899_v49 = vpop.f32.mrf.mxu1 }
 0x355   :  { %v942_v38 = vadd.f32 %v879_v24, %v3317_v50  ;;  %v943_v44 = vadd.f32 %v899_v49, %v3321_v46  ;;  %v3325_v50 = vld [vmem:[#allocation49_spill] sm:$0xff] }
 0x356   :  { %v3326_v24 = vsel %vm2187_vm4, %v3294_v12, %v3325_v50 }
 0x357   :  { %v946_v3 = vmul.f32 0.5, %v942_v38  ;;  %v950_v28 = vmul.f32 0.5, %v943_v44 }
 0x359   :  { %1457 = vtanh.f32 %v946_v3 }
 0x35a   :  { %1459 = vtanh.f32 %v950_v28 }
 0x35b   :  { %v919_v39 = vpop.f32.mrf.mxu2  ;;  %v939_v7 = vpop.f32.mrf.mxu3 }
 0x35c   :  { %v944_v43 = vadd.f32 %v919_v39, %v3324_v30  ;;  %v945_v19 = vadd.f32 %v939_v7, %v3326_v24 }
 0x35e   :  { %1461 = vtanh.f32 %v944_v43  ;;  %v955_v46 = vmul.f32 0.5, %v945_v19 }
 0x35f   :  { %v1458_v49 = vpop.eup %1457 }
 0x360   :  { %v1460_v38 = vpop.eup %1459  ;;  %v948_v3 = vmul.f32 0.5, %v1458_v49  ;;  %1463 = vtanh.f32 %v955_v46 }
 0x361   :  { %v952_v22 = vmul.f32 0.5, %v1460_v38 }
 0x362   :  { %v949_v9 = vadd.f32 0.5, %v948_v3 }
 0x363   :  { %v953_v44 = vadd.f32 0.5, %v952_v22 }
 0x364   :  { %v1462_v28 = vpop.eup %1461 }
 0x365   :  { %v959_v40 = vmul.f32 %v953_v44, %v2718_v15  ;;  %v960_v45 = vmul.f32 %v1462_v28, %v949_v9 }
 0x366   :  { %v1464_v39 = vpop.eup %1463 }
 0x367   :  { %v2802_v30 = vadd.f32 %v960_v45, %v959_v40  ;;  %v957_v12 = vmul.f32 0.5, %v1464_v39 }
 0x369   :  { %1465 = vtanh.f32 %v2802_v30  ;;  %v958_v7 = vadd.f32 0.5, %v957_v12 }
 0x36f   :  { %v1466_v43 = vpop.eup %1465 }
 0x370   :  { %v963_v19 = vmul.f32 %v1466_v43, %v958_v7  ;;  %v1297_v7 = vld [vmem:[%s2986_s4 + $0x78] sm:$0xff] }
 0x372   :  { %984 = vmatmul.f32.vlgmr.msra.gmra.mxu0 %v963_v19  ;;  %1004 = vmatmul.f32.vlgmr.msra.gmra.mxu1 %v963_v19 }
 0x373   :  { %1024 = vmatmul.f32.vlgmr.msrb.gmra.mxu2 %v963_v19  ;;  %1044 = vmatmul.f32.vlgmr.msra.gmra.mxu3 %v963_v19 }
 0x374   :  { %1180 = vmatpush.msra.mxu0 %v2425_v6  ;;  %1200 = vmatpush.msra.mxu1 %v2428_v10  ;;  %v3327_v6 = vld [vmem:[#allocation9_spill] sm:$0xff]  ;;  %v3328_v10 = vld [vmem:[#allocation12_spill] sm:$0xff] }
 0x375   :  { %1220 = vmatpush.msrb.mxu2 %v2557_v0  ;;  %1240 = vmatpush.msra.mxu3 %v2432_v52  ;;  %v3329_v52 = vld [vmem:[#allocation18_spill] sm:$0xff]  ;;  %v3348_v0 = vld [vmem:[#allocation57_spill] sm:$0xff] }
 0x376   :  { %1181 = vmatpush.msra.mxu0 %v2435_v36  ;;  %1201 = vmatpush.msra.mxu1 %v2438_v20  ;;  %v3330_v36 = vld [vmem:[#allocation13_spill] sm:$0xff]  ;;  %v3331_v20 = vld [vmem:[#allocation10_spill] sm:$0xff] }
 0x377   :  { %1221 = vmatpush.msrb.mxu2 %v2563_v42  ;;  %1241 = vmatpush.msra.mxu3 %v2442_v29  ;;  %v3332_v29 = vld [vmem:[#allocation15_spill] sm:$0xff] }
 0x378   :  { %1182 = vmatpush.msra.mxu0 %v2445_v14  ;;  %1202 = vmatpush.msra.mxu1 %v2448_v53  ;;  %v3333_v14 = vld [vmem:[#allocation21_spill] sm:$0xff]  ;;  %v3334_v53 = vld [vmem:[#allocation16_spill] sm:$0xff] }
 0x379   :  { %1222 = vmatpush.msrb.mxu2 %v2569_v5  ;;  %1242 = vmatpush.msra.mxu3 %v2452_v18  ;;  %v3335_v18 = vld [vmem:[#allocation11_spill] sm:$0xff] }
 0x37a   :  { %1183 = vmatpush.msra.mxu0 %v2455_v26  ;;  %1203 = vmatpush.msra.mxu1 %v2458_v55  ;;  %v3336_v26 = vld [vmem:[#allocation20_spill] sm:$0xff]  ;;  %v3337_v55 = vld [vmem:[#allocation26_spill] sm:$0xff]  ;;  %v3378_v5 = vld [vmem:[#allocation67_spill] sm:$0xff] }
 0x37b   :  { %1223 = vmatpush.msrb.mxu2 %v2575_v8  ;;  %1243 = vmatpush.msra.mxu3 %v2462_v13  ;;  %v3338_v13 = vld [vmem:[#allocation22_spill] sm:$0xff]  ;;  %v3350_v8 = vld [vmem:[#allocation56_spill] sm:$0xff] }
 0x37c   :  { %1184 = vmatpush.msra.mxu0 %v2465_v1  ;;  %1204 = vmatpush.msra.mxu1 %v2468_v59  ;;  %v3339_v1 = vld [vmem:[#allocation14_spill] sm:$0xff]  ;;  %v3340_v59 = vld [vmem:[#allocation24_spill] sm:$0xff] }
 0x37d   :  { %1224 = vmatpush.msrb.mxu2 %v2581_v31  ;;  %1244 = vmatpush.msra.mxu3 %v2472_v23  ;;  %v3341_v23 = vld [vmem:[#allocation32_spill] sm:$0xff]  ;;  %v3351_v31 = vld [vmem:[#allocation45_spill] sm:$0xff] }
 0x37e   :  { %1185 = vmatpush.msra.mxu0 %v2475_v32  ;;  %1205 = vmatpush.msra.mxu1 %v2478_v63  ;;  %v3342_v32 = vld [vmem:[#allocation25_spill] sm:$0xff] }
 0x37f   :  { %1225 = vmatpush.msrb.mxu2 %v2587_v33  ;;  %1245 = vmatpush.msra.mxu3 %v2482_v61  ;;  %v3343_v63 = vld [vmem:[#allocation17_spill] sm:$0xff]  ;;  %v3344_v61 = vld [vmem:[#allocation28_spill] sm:$0xff]  ;;  %v3352_v33 = vsel %vm2154_vm3, %v3350_v8, %v3351_v31 }
 0x380   :  { %1186 = vmatpush.msra.mxu0 %v2485_v27  ;;  %1206 = vmatpush.msra.mxu1 %v2488_v2  ;;  %v3345_v27 = vld [vmem:[#allocation35_spill] sm:$0xff]  ;;  %v3346_v2 = vld [vmem:[#allocation29_spill] sm:$0xff] }
 0x381   :  { %1226 = vmatpush.msrb.mxu2 %v2593_v34  ;;  %1246 = vmatpush.msra.mxu3 %v2596_v35 }
 0x382   :  { %1187 = vmatpush.msra.mxu0 %v2493_v21  ;;  %1207 = vmatpush.msra.mxu1 %v2496_v4  ;;  %v3347_v21 = vld [vmem:[#allocation19_spill] sm:$0xff] }
 0x383   :  { %1227 = vmatpush.msrb.mxu2 %v2601_v37  ;;  %1247 = vmatpush.msra.mxu3 %v2604_v41 }
 0x384   :  { %1188 = vmatpush.msra.mxu0 %v2501_v17  ;;  %1208 = vmatpush.msra.mxu1 %v2608_v47 }
 0x385   :  { %1228 = vmatpush.msrb.mxu2 %v2611_v48  ;;  %1248 = vmatpush.msra.mxu3 %v2614_v51  ;;  %v3354_v51 = vld [vmem:[#allocation66_spill] sm:$0xff] }
 0x386   :  { %1189 = vmatpush.msra.mxu0 %v2617_v54  ;;  %1209 = vmatpush.msra.mxu1 %v2620_v56  ;;  %v3355_v54 = vld [vmem:[#allocation54_spill] sm:$0xff] }
 0x387   :  { %1229 = vmatpush.msrb.mxu2 %v2623_v57  ;;  %1249 = vmatpush.msra.mxu3 %v2626_v58  ;;  %v3356_v56 = vsel %vm2241_vm5, %v3354_v51, %v3355_v54  ;;  %v3357_v58 = vld [vmem:[#allocation59_spill] sm:$0xff]  ;;  %v1296_v51 = vld [vmem:[%s2986_s4 + $0x70] sm:$0xff]  ;;  %v1295_v54 = vld [vmem:[%s2986_s4 + $0x68] sm:$0xff] }
 0x388   :  { %1190 = vmatpush.msra.mxu0 %v2629_v60  ;;  %1210 = vmatpush.msra.mxu1 %v2632_v62  ;;  %v3358_v60 = vld [vmem:[#allocation46_spill] sm:$0xff] }
 0x389   :  { %1230 = vmatpush.msrb.mxu2 %v2635_v16  ;;  %1250 = vmatpush.msra.mxu3 %v3327_v6  ;;  %v3359_v62 = vsel %vm2187_vm4, %v3357_v58, %v3358_v60  ;;  %v1292_v58 = vld [vmem:[%s2986_s4 + $0x50] sm:$0xff]  ;;  %v1291_v60 = vld [vmem:[%s2986_s4 + $0x48] sm:$0xff] }
 0x38a   :  { %1191 = vmatpush.msra.mxu0 %v3328_v10  ;;  %1211 = vmatpush.msra.mxu1 %v3329_v52  ;;  %v3361_v10 = vld [vmem:[#allocation60_spill] sm:$0xff] }
 0x38b   :  { %1231 = vmatpush.msrb.mxu2 %v3330_v36  ;;  %1251 = vmatpush.msra.mxu3 %v3331_v20  ;;  %v3362_v52 = vld [vmem:[#allocation8_spill] sm:$0xff] }
 0x38c   :  { %1192 = vmatpush.msra.mxu0 %v3332_v29  ;;  %1212 = vmatpush.msra.mxu1 %v3333_v14  ;;  %v3363_v36 = vsel %vm2154_vm3, %v3361_v10, %v3362_v52  ;;  %v3375_v10 = vld [vmem:[#allocation70_spill] sm:$0xff] }
 0x38d   :  { %1232 = vmatpush.msrb.mxu2 %v3334_v53  ;;  %1252 = vmatpush.msra.mxu3 %v3335_v18 }
 0x38e   :  { %1193 = vmatpush.msra.mxu0 %v3336_v26  ;;  %1213 = vmatpush.msra.mxu1 %v3337_v55  ;;  %v3364_v26 = vld [vmem:[#allocation69_spill] sm:$0xff]  ;;  %v3365_v55 = vld [vmem:[#allocation48_spill] sm:$0xff] }
 0x38f   :  { %1233 = vmatpush.msrb.mxu2 %v3338_v13  ;;  %1253 = vmatpush.msra.mxu3 %v3339_v1  ;;  %v3366_v13 = vsel %vm2241_vm5, %v3364_v26, %v3365_v55 }
 0x390   :  { %1194 = vmatpush.msra.mxu0 %v3340_v59  ;;  %1214 = vmatpush.msra.mxu1 %v3341_v23  ;;  %v3367_v59 = vld [vmem:[#allocation63_spill] sm:$0xff] }
 0x391   :  { %1234 = vmatpush.msrb.mxu2 %v3342_v32  ;;  %1254 = vmatpush.msra.mxu3 %v3343_v63  ;;  %v3368_v23 = vld [vmem:[#allocation43_spill] sm:$0xff] }
 0x392   :  { %1195 = vmatpush.msra.mxu0 %v3344_v61  ;;  %1215 = vmatpush.msra.mxu1 %v3345_v27  ;;  %v3369_v32 = vsel %vm2187_vm4, %v3367_v59, %v3368_v23 }
 0x393   :  { %1235 = vmatpush.msrb.mxu2 %v3346_v2  ;;  %1255 = vmatpush.msra.mxu3 %v3347_v21 }
 0x3ef   :  { %v985_v4 = vpop.f32.mrf.mxu0  ;;  %v1005_v17 = vpop.f32.mrf.mxu1 }
 0x3f0   :  { %v1048_v42 = vadd.f32 %v985_v4, %v3348_v0  ;;  %v1049_v34 = vadd.f32 %v1005_v17, %v3352_v33 }
 0x3f2   :  { %v1052_v35 = vmul.f32 0.5, %v1048_v42  ;;  %v1056_v37 = vmul.f32 0.5, %v1049_v34 }
 0x3f4   :  { %1467 = vtanh.f32 %v1052_v35 }
 0x3f5   :  { %1469 = vtanh.f32 %v1056_v37 }
 0x3f6   :  { %v1025_v41 = vpop.f32.mrf.mxu2  ;;  %v1045_v47 = vpop.f32.mrf.mxu3 }
 0x3f7   :  { %v1050_v57 = vadd.f32 %v1025_v41, %v3356_v56  ;;  %v1051_v16 = vadd.f32 %v1045_v47, %v3359_v62  ;;  %v1294_v56 = vld [vmem:[%s2986_s4 + $0x60] sm:$0xff] }
 0x3f8   :  { %v1290_v62 = vld [vmem:[%s2986_s4 + $0x40] sm:$0xff] }
 0x3f9   :  { %1471 = vtanh.f32 %v1050_v57  ;;  %v1061_v15 = vmul.f32 0.5, %v1051_v16  ;;  %v1293_v57 = vld [vmem:[%s2986_s4 + $0x58] sm:$0xff] }
 0x3fa   :  { %v1468_v40 = vpop.eup %1467  ;;  %v1289_v16 = vld [vmem:[%s2986_s4 + $0x38] sm:$0xff] }
 0x3fb   :  { %v1470_v25 = vpop.eup %1469  ;;  %v1054_v50 = vmul.f32 0.5, %v1468_v40  ;;  %1473 = vtanh.f32 %v1061_v15  ;;  %v1288_v15 = vld [vmem:[%s2986_s4 + $0x30] sm:$0xff]  ;;  %v1287_v40 = vld [vmem:[%s2986_s4 + $0x28] sm:$0xff] }
 0x3fc   :  { %v1058_v24 = vmul.f32 0.5, %v1470_v25  ;;  %v1286_v25 = vld [vmem:[%s2986_s4 + $0x20] sm:$0xff] }
 0x3fd   :  { %v1055_v46 = vadd.f32 0.5, %v1054_v50  ;;  %v1285_v50 = vld [vmem:[%s2986_s4 + $0x18] sm:$0xff] }
 0x3fe   :  { %v1059_v49 = vadd.f32 0.5, %v1058_v24  ;;  %v1284_v24 = vld [vmem:[%s2986_s4 + $0x10] sm:$0xff] }
 0x3ff   :  { %v1472_v38 = vpop.eup %1471 }
 0x400   :  { %v1065_v3 = vmul.f32 %v1059_v49, %v2802_v30  ;;  %v1066_v22 = vmul.f32 %v1472_v38, %v1055_v46  ;;  %v3360_v30 = vld [vmem:[#allocation42_spill] sm:$0xff]  ;;  %v1283_v46 = vld [vmem:[%s2986_s4 + $0x8] sm:$0xff]  ;;  %v1282_v49 = vld [vmem:[%s2986_s4] sm:$0xff] }
 0x401   :  { %v1474_v9 = vpop.eup %1473  ;;  %v1323_v38 = vld [vmem:[%s2988_s6] sm:$0x1f] }
 0x402   :  { %v1067_v44 = vadd.f32 %v1066_v22, %v1065_v3  ;;  %v1063_v28 = vmul.f32 0.5, %v1474_v9  ;;  %v3370_v9 = vld [vmem:[#allocation44_spill] sm:$0xff] }
 0x404   :  { %1475 = vtanh.f32 %v1067_v44  ;;  %v1064_v45 = vadd.f32 0.5, %v1063_v28  ;;  %v3371_v28 = vld [vmem:[#allocation65_spill] sm:$0xff] }
 0x40a   :  { %v1476_v39 = vpop.eup %1475 }
 0x40b   :  { %v1069_v12 = vmul.f32 %v1476_v39, %v1064_v45  ;;  %v3372_v45 = vld [vmem:[#allocation64_spill] sm:$0xff] }
 0x40c   :  { %v3373_v39 = vsel %vm2154_vm3, %v3371_v28, %v3372_v45 }
 0x40d   :  { %1090 = vmatmul.f32.vlgmr.msrb.gmra.mxu0 %v1069_v12  ;;  %1110 = vmatmul.f32.vlgmr.msrb.gmra.mxu1 %v1069_v12 }
 0x40e   :  { %1130 = vmatmul.f32.vlgmr.msra.gmra.mxu2 %v1069_v12  ;;  %1150 = vmatmul.f32.vlgmr.msrb.gmra.mxu3 %v1069_v12 }
 0x40f   :  { %1302 = vmatpush.msrb.mxu0 %v1297_v7  ;;  %1400 = vmatpush.msk.msrb.mxu1 %vm1332_vm6, %v1323_v38 }
 0x411   :  { %1303 = vmatpush.msrb.mxu0 %v1296_v51 }
 0x413   :  { %1304 = vmatpush.msrb.mxu0 %v1295_v54 }
 0x415   :  { %1305 = vmatpush.msrb.mxu0 %v1294_v56 }
 0x417   :  { %1306 = vmatpush.msrb.mxu0 %v1293_v57 }
 0x419   :  { %1307 = vmatpush.msrb.mxu0 %v1292_v58 }
 0x41b   :  { %1308 = vmatpush.msrb.mxu0 %v1291_v60 }
 0x41d   :  { %1309 = vmatpush.msrb.mxu0 %v1290_v62 }
 0x41f   :  { %1310 = vmatpush.msrb.mxu0 %v1289_v16 }
 0x421   :  { %1311 = vmatpush.msrb.mxu0 %v1288_v15 }
 0x423   :  { %1312 = vmatpush.msrb.mxu0 %v1287_v40 }
 0x425   :  { %1313 = vmatpush.msrb.mxu0 %v1286_v25 }
 0x427   :  { %1314 = vmatpush.msrb.mxu0 %v1285_v50 }
 0x429   :  { %1315 = vmatpush.msrb.mxu0 %v1284_v24 }
 0x42b   :  { %1316 = vmatpush.msrb.mxu0 %v1283_v46 }
 0x42d   :  { %1317 = vmatpush.msrb.mxu0 %v1282_v49 }
 0x48a   :  { %v1091_v43 = vpop.f32.mrf.mxu0  ;;  %v1111_v19 = vpop.f32.mrf.mxu1 }
 0x48b   :  { %v1154_v6 = vadd.f32 %v1091_v43, %v3360_v30  ;;  %v1155_v20 = vadd.f32 %v1111_v19, %v3363_v36 }
 0x48d   :  { %v1158_v29 = vmul.f32 0.5, %v1154_v6  ;;  %v1162_v14 = vmul.f32 0.5, %v1155_v20  ;;  %v3374_v6 = vld [vmem:[#allocation71_spill] sm:$0xff]  ;;  %v3377_v20 = vld [vmem:[#allocation68_spill] sm:$0xff] }
 0x48e   :  { %v3376_v52 = vsel %vm2241_vm5, %v3374_v6, %v3375_v10 }
 0x48f   :  { %1477 = vtanh.f32 %v1158_v29  ;;  %v3379_v29 = vsel %vm2187_vm4, %v3377_v20, %v3378_v5 }
 0x490   :  { %1479 = vtanh.f32 %v1162_v14 }
 0x491   :  { %v1131_v53 = vpop.f32.mrf.mxu2  ;;  %v1151_v18 = vpop.f32.mrf.mxu3 }
 0x492   :  { %v1156_v1 = vadd.f32 %v1131_v53, %v3366_v13  ;;  %v1157_v63 = vadd.f32 %v1151_v18, %v3369_v32 }
 0x494   :  { %1481 = vtanh.f32 %v1156_v1  ;;  %v1167_v61 = vmul.f32 0.5, %v1157_v63 }
 0x495   :  { %v1478_v27 = vpop.eup %1477 }
 0x496   :  { %v1480_v2 = vpop.eup %1479  ;;  %v1160_v21 = vmul.f32 0.5, %v1478_v27  ;;  %1483 = vtanh.f32 %v1167_v61 }
 0x497   :  { %v1164_v4 = vmul.f32 0.5, %v1480_v2 }
 0x498   :  { %v1161_v17 = vadd.f32 0.5, %v1160_v21 }
 0x499   :  { %v1165_v0 = vadd.f32 0.5, %v1164_v4  ;;  %v1415_v4 = vld [vmem:[%s2987_s5] ss:$0 sm:$0xff] }
 0x49a   :  { %v1482_v42 = vpop.eup %1481 }
 0x49b   :  { %v1171_v8 = vmul.f32 %v1165_v0, %v1067_v44  ;;  %v1172_v31 = vmul.f32 %v1482_v42, %v1161_v17 }
 0x49c   :  { %v1484_v33 = vpop.eup %1483 }
 0x49d   :  { %v2905_v34 = vadd.f32 %v1172_v31, %v1171_v8  ;;  %v1169_v35 = vmul.f32 0.5, %v1484_v33  ;;  %v1416_v8 = vld [vmem:[%s2989_s7] ss:$0 sm:$0xff] }
 0x49f   :  { %1485 = vtanh.f32 %v2905_v34  ;;  %v1170_v37 = vadd.f32 0.5, %v1169_v35 }
 0x4a5   :  { %v1486_v41 = vpop.eup %1485 }
 0x4a6   :  { %v1175_v47 = vmul.f32 %v1486_v41, %v1170_v37 }
 0x4a8   :  { %1196 = vmatmul.f32.vlgmr.msra.gmra.mxu0 %v1175_v47  ;;  %1216 = vmatmul.f32.vlgmr.msra.gmra.mxu1 %v1175_v47 }
 0x4a9   :  { %1236 = vmatmul.f32.vlgmr.msrb.gmra.mxu2 %v1175_v47  ;;  %1256 = vmatmul.f32.vlgmr.msra.gmra.mxu3 %v1175_v47 }
 0x525   :  { %v1197_v3 = vpop.f32.mrf.mxu0  ;;  %v1217_v22 = vpop.f32.mrf.mxu1 }
 0x526   :  { %v1260_v44 = vadd.f32 %v1197_v3, %v3370_v9  ;;  %v1261_v12 = vadd.f32 %v1217_v22, %v3373_v39 }
 0x528   :  { %v1264_v7 = vmul.f32 0.5, %v1260_v44  ;;  %v1268_v43 = vmul.f32 0.5, %v1261_v12 }
 0x52a   :  { %1487 = vtanh.f32 %v1264_v7 }
 0x52b   :  { %1489 = vtanh.f32 %v1268_v43 }
 0x52c   :  { %v1237_v19 = vpop.f32.mrf.mxu2  ;;  %v1257_v30 = vpop.f32.mrf.mxu3 }
 0x52d   :  { %v1262_v36 = vadd.f32 %v1237_v19, %v3376_v52  ;;  %v1263_v14 = vadd.f32 %v1257_v30, %v3379_v29 }
 0x52f   :  { %1491 = vtanh.f32 %v1262_v36  ;;  %v1273_v53 = vmul.f32 0.5, %v1263_v14 }
 0x530   :  { %v1488_v18 = vpop.eup %1487 }
 0x531   :  { %v1490_v26 = vpop.eup %1489  ;;  %v1266_v55 = vmul.f32 0.5, %v1488_v18  ;;  %1493 = vtanh.f32 %v1273_v53 }
 0x532   :  { %v1270_v13 = vmul.f32 0.5, %v1490_v26 }
 0x533   :  { %v1267_v1 = vadd.f32 0.5, %v1266_v55 }
 0x534   :  { %v1271_v59 = vadd.f32 0.5, %v1270_v13 }
 0x535   :  { %v1492_v48 = vpop.eup %1491 }
 0x536   :  { %v1277_v23 = vmul.f32 %v1271_v59, %v2905_v34  ;;  %v1278_v32 = vmul.f32 %v1492_v48, %v1267_v1 }
 0x537   :  { %v1494_v63 = vpop.eup %1493 }
 0x538   :  { %v1279_v61 = vadd.f32 %v1278_v32, %v1277_v23  ;;  %v1275_v11 = vmul.f32 0.5, %v1494_v63 }
 0x53a   :  { %1495 = vtanh.f32 %v1279_v61  ;;  %v1276_v27 = vadd.f32 0.5, %v1275_v11 }
 0x540   :  { %v1496_v2 = vpop.eup %1495 }
 0x541   :  { %v1281_v21 = vmul.f32 %v1496_v2, %v1276_v27 }
 0x543   :  { %1318 = vmatmul.f32.vlgmr.msrb.gmra.mxu0 %v1281_v21 }
 0x5c0   :  { %v1319_v17 = vpop.f32.mrf.mxu0 }
 0x5c1   :  { %v1320_v0 = vadd.f32 %v1415_v4, %v1319_v17 }
 0x5c3   :  { %v1322_v42 = vmax.f32 %v1320_v0, 0.0 }
 0x5c5   :  { %1401 = vmatmul.msk.f32.vlgmr.msrb.gmra.mxu1 %vm1328_vm7, %v1322_v42 }
 0x642   :  { %v1353_v31 = vpop.f32.mrf.mxu1 }
 0x643   :  { %v1354_v33 = vadd.f32 %v1416_v8, %v1353_v31 }
 0x645   :  { %1357 = vst.msk [vmem:[%s2990_s8] sm:$0xff] %vm1356_vm8, %v1354_v33 }
 0x646   :  { %1362 = vsyncpa [#allocation3], 1 }
 0x647   :  { %1363 = vsyncpa [#allocation5], 1 }

</bundles_post_ra>
